<compile_context>
chip_gen: v7x
topology: tpu7x:2x2x1
jax: 0.10.0
libtpu: 0.0.40
codegen_flags: <defaults>
</compile_context>

<pallas_src>
import jax
import jax.numpy as jnp
import numpy as np
from jax.experimental import pallas as pl
from jax.experimental.pallas import tpu as pltpu

BN_EPS = 1e-5
LANE = 128
SUBLANE = 8


def _round_up(x, m):
    return (x + m - 1) // m * m


# -----------------------------------------------------------------------------
# Pallas kernel:  sum_g(x_g @ W1_g) + b1 -> ReLU -> [dot -> ReLU]* -> dot
# (every BatchNorm affine is already folded into the W/b operands)
# -----------------------------------------------------------------------------
def _make_mlp_kernel(n_groups, n_hidden):
    def kernel(*refs):
        o_ref = refs[-1]
        xs = refs[:n_groups]                      # per-group activation tiles
        ws = refs[n_groups:2 * n_groups]          # per-group first-layer weights
        b1_ref = refs[2 * n_groups]

        cdt = ws[0].dtype                         # MXU operand dtype (f32 / bf16)

        # ---- first Linear: split-K over input groups (emb cols + numericals)
        acc = jnp.dot(xs[0][...].astype(cdt), ws[0][...],
                      preferred_element_type=jnp.float32)
        for g in range(1, n_groups):
            acc += jnp.dot(xs[g][...].astype(cdt), ws[g][...],
                           preferred_element_type=jnp.float32)
        h = jnp.maximum(acc + b1_ref[...], 0.0)   # ReLU; BN folds live in W/b

        # ---- remaining hidden layers: pure dot + relu
        idx = 2 * n_groups + 1
        for _ in range(n_hidden - 1):
            w_ref, b_ref = refs[idx], refs[idx + 1]
            idx += 2
            y = jnp.dot(h.astype(w_ref.dtype), w_ref[...],
                        preferred_element_type=jnp.float32) + b_ref[...]
            h = jnp.maximum(y, 0.0)

        # ---- output Linear (last BN folded in); lane-dense padded output
        wo_ref, bo_ref = refs[idx], refs[idx + 1]
        o_ref[...] = (jnp.dot(h.astype(wo_ref.dtype), wo_ref[...],
                              preferred_element_type=jnp.float32)
                      + bo_ref[...]).astype(o_ref.dtype)

    return kernel


# -----------------------------------------------------------------------------
# Wrapper: glue (gather), BN folding, padding, pallas_call
# -----------------------------------------------------------------------------
def tabular_forward_pallas(numerical_data, cat_data, params, *,
                           batch_tile=256, weight_dtype=jnp.bfloat16):
    emb_tables = params["emb_tables"]
    n_num = 0 if numerical_data is None else numerical_data.shape[1]
    B = numerical_data.shape[0] if n_num else cat_data.shape[0]
    n_emb = sum(int(t.shape[1]) for t in emb_tables)

    lin = params["lin_layers"]
    bns = params["bn_layers"]
    n_hidden = len(lin)

    def bn_scale_shift(bn):
        s = bn["gamma"] / jnp.sqrt(bn["var"] + BN_EPS)
        return s, bn["beta"] - bn["mean"] * s

    # ---- glue: per-column embedding lookups (XLA gather); emb_dropout = id (eval)
    groups = [jnp.take(tbl, cat_data[:, i], axis=0).astype(jnp.float32)
              for i, tbl in enumerate(emb_tables)]
    if n_num:
        groups.append(numerical_data.astype(jnp.float32))

    # ---- fold first BN (numerical cols) + every hidden BN into the next Linear
    w1t = lin[0]["weight"].T.astype(jnp.float32)           # (D_in, H1)
    b1 = lin[0]["bias"].astype(jnp.float32)
    h1 = w1t.shape[1]
    h1_pad = _round_up(h1, LANE)
    if n_num:
        s0, t0 = bn_scale_shift(params["first_bn"])
        b1 = b1 + t0 @ w1t[n_emb:, :]

    x_groups, w1_blocks = [], []
    off = 0
    for gi, g in enumerate(groups):
        d_g = g.shape[1]
        k_pad = _round_up(d_g, SUBLANE)
        blk = w1t[off:off + d_g, :]
        if n_num and gi == len(groups) - 1:                 # numerical rows: fold BN scale
            blk = s0[:, None] * blk
        w1_blocks.append(jnp.pad(blk, ((0, k_pad - d_g), (0, h1_pad - h1))))
        x_groups.append(jnp.pad(g, ((0, 0), (0, k_pad - d_g))))
        off += d_g
    b1p = jnp.pad(b1, (0, h1_pad - h1)).reshape(1, h1_pad)

    hidden_ws, hidden_bs = [], []
    prev, prev_pad = h1, h1_pad
    for k in range(1, n_hidden):
        s, t = bn_scale_shift(bns[k - 1])
        wt = lin[k]["weight"].T.astype(jnp.float32)         # (H_{k-1}, H_k)
        b = lin[k]["bias"].astype(jnp.float32) + t @ wt
        wt = s[:, None] * wt
        hk = wt.shape[1]
        hk_pad = _round_up(hk, LANE)
        hidden_ws.append(jnp.pad(wt, ((0, prev_pad - prev), (0, hk_pad - hk))))
        hidden_bs.append(jnp.pad(b, (0, hk_pad - hk)).reshape(1, hk_pad))
        prev, prev_pad = hk, hk_pad

    s, t = bn_scale_shift(bns[n_hidden - 1])
    wot = params["output_layer"]["weight"].T.astype(jnp.float32)
    bo = params["output_layer"]["bias"].astype(jnp.float32) + t @ wot
    wot = s[:, None] * wot
    f = wot.shape[1]
    f_pad = _round_up(f, LANE)
    wo = jnp.pad(wot, ((0, prev_pad - prev), (0, f_pad - f)))
    bop = jnp.pad(bo, (0, f_pad - f)).reshape(1, f_pad)

    # ---- MXU operand dtype (bf16 recommended on v6e/v7x); biases stay f32
    w1_blocks = [w.astype(weight_dtype) for w in w1_blocks]
    hidden_ws = [w.astype(weight_dtype) for w in hidden_ws]
    wo = wo.astype(weight_dtype)

    # ---- batch tiling: big MXU-shaped tiles, grid >= 2 when B allows
    bt = _round_up(min(batch_tile, _round_up(B, SUBLANE)), SUBLANE)
    B_pad = _round_up(B, bt)
    if B_pad != B:
        x_groups = [jnp.pad(g, ((0, B_pad - B), (0, 0))) for g in x_groups]

    G = len(x_groups)
    operands = list(x_groups) + list(w1_blocks) + [b1p]
    in_specs = ([pl.BlockSpec((bt, g.shape[1]), lambda i: (i, 0)) for g in x_groups]
                + [pl.BlockSpec(w.shape, lambda i: (0, 0)) for w in w1_blocks]
                + [pl.BlockSpec(b1p.shape, lambda i: (0, 0))])
    mm_shapes = [w.shape for w in w1_blocks]
    for w, b in zip(hidden_ws, hidden_bs):
        operands += [w, b]
        in_specs += [pl.BlockSpec(w.shape, lambda i: (0, 0)),
                     pl.BlockSpec(b.shape, lambda i: (0, 0))]
        mm_shapes.append(w.shape)
    operands += [wo, bop]
    in_specs += [pl.BlockSpec(wo.shape, lambda i: (0, 0)),
                 pl.BlockSpec(bop.shape, lambda i: (0, 0))]
    mm_shapes.append(wo.shape)

    flops = 2 * B_pad * sum(int(k) * int(n) for k, n in mm_shapes)
    bytes_accessed = (sum(int(np.prod(o.shape)) * o.dtype.itemsize for o in operands)
                      + B_pad * f_pad * 4)

    out = pl.pallas_call(
        _make_mlp_kernel(G, n_hidden),
        out_shape=jax.ShapeDtypeStruct((B_pad, f_pad), jnp.float32),
        grid_spec=pltpu.PrefetchScalarGridSpec(
            num_scalar_prefetch=0,
            grid=(B_pad // bt,),
            in_specs=in_specs,
            out_specs=pl.BlockSpec((bt, f_pad), lambda i: (i, 0)),
        ),
        compiler_params=pltpu.CompilerParams(
            dimension_semantics=("parallel",),        # megacore-splittable on v7x
            vmem_limit_bytes=48 * 1024 * 1024,        # headroom under v7x 64 MiB
        ),
        cost_estimate=pl.CostEstimate(flops=flops, transcendentals=0,
                                      bytes_accessed=bytes_accessed),
    )(*operands)
    return out[:B, :f]


# -----------------------------------------------------------------------------
# Deterministic parameter init (mirrors the module's __init__ shapes).
# BN params are randomized so the folding path is actually exercised.
# -----------------------------------------------------------------------------
def init_params(key, emb_dims, no_of_numerical, lin_layer_sizes, output_size):
    keys = iter(jax.random.split(key, 128))
    params = {}

    # nn.Embedding default init: N(0, 1)
    params["emb_tables"] = [
        jax.random.normal(next(keys), (n, d), jnp.float32) for n, d in emb_dims
    ]
    no_of_embs = sum(d for _, d in emb_dims)

    def bn(size):
        k1, k2, k3, k4 = jax.random.split(next(keys), 4)
        return {
            "gamma": jax.random.uniform(k1, (size,), jnp.float32, 0.5, 1.5),
            "beta": 0.1 * jax.random.normal(k2, (size,), jnp.float32),
            "mean": 0.1 * jax.random.normal(k3, (size,), jnp.float32),
            "var": jax.random.uniform(k4, (size,), jnp.float32, 0.5, 1.5),
        }

    def linear(fan_in, fan_out):
        # kaiming_normal_ on weight, PyTorch-default uniform bias
        w = jax.random.normal(next(keys), (fan_out, fan_in), jnp.float32) * np.sqrt(2.0 / fan_in)
        bound = 1.0 / np.sqrt(fan_in)
        b = jax.random.uniform(next(keys), (fan_out,), jnp.float32, -bound, bound)
        return {"weight": w, "bias": b}

    sizes = [no_of_embs + no_of_numerical] + list(lin_layer_sizes)
    params["lin_layers"] = [linear(sizes[i], sizes[i + 1]) for i in range(len(lin_layer_sizes))]
    params["bn_layers"] = [bn(s) for s in lin_layer_sizes]
    params["first_bn"] = bn(no_of_numerical)
    params["output_layer"] = linear(lin_layer_sizes[-1], output_size)
    return params


# -----------------------------------------------------------------------------
# Pure-JAX reference (mirrors the PyTorch module, eval mode)
# -----------------------------------------------------------------------------
def reference_forward(numerical_data, cat_data, params):
    emb_cols = [jnp.take(tbl, cat_data[:, i], axis=0)
                for i, tbl in enumerate(params["emb_tables"])]
    x_emb = jnp.concatenate(emb_cols, axis=1)  # emb_dropout: identity (eval)

    bn0 = params["first_bn"]
    num = (numerical_data - bn0["mean"]) / jnp.sqrt(bn0["var"] + BN_EPS) * bn0["gamma"] + bn0["beta"]
    x = jnp.concatenate([x_emb, num], axis=1)

    for lin, bn_ in zip(params["lin_layers"], params["bn_layers"]):
        x = jnp.maximum(x @ lin["weight"].T + lin["bias"], 0.0)
        x = (x - bn_["mean"]) / jnp.sqrt(bn_["var"] + BN_EPS) * bn_["gamma"] + bn_["beta"]
        # dropout: identity (eval)
    out = params["output_layer"]
    return x @ out["weight"].T + out["bias"]


if __name__ == "__main__":
    # Small-but-MXU-shaped config consistent with the module
    emb_dims = [(10, 4), (8, 3), (6, 5)]      # no_of_embs = 12
    no_of_numerical = 4                       # D_in = 16
    lin_layer_sizes = [64, 32]
    output_size = 8
    batch = 512                               # batch_tile=256 -> grid of 2

    key = jax.random.PRNGKey(0)
    k_par, k_num, *k_cat = jax.random.split(key, 2 + len(emb_dims))

    params = init_params(k_par, emb_dims, no_of_numerical, lin_layer_sizes, output_size)

    numerical_data = jax.random.normal(k_num, (batch, no_of_numerical), jnp.float32)
    cat_data = jnp.stack(
        [jax.random.randint(k_cat[i], (batch,), 0, n, jnp.int32)
         for i, (n, _) in enumerate(emb_dims)],
        axis=1,
    )

    ref = reference_forward(numerical_data, cat_data, params)

    # f32 MXU operands: tight check of the BN-folded / padded kernel
    out_f32 = tabular_forward_pallas(numerical_data, cat_data, params,
                                     batch_tile=256, weight_dtype=jnp.float32)
    out_f32 = jax.block_until_ready(out_f32)
    np.testing.assert_allclose(np.asarray(out_f32), np.asarray(ref), rtol=1e-4, atol=1e-4)

    # bf16 MXU operands (v6e/v7x recommendation): looser tolerance for bf16 rounding
    out_bf16 = tabular_forward_pallas(numerical_data, cat_data, params,
                                      batch_tile=256, weight_dtype=jnp.bfloat16)
    out_bf16 = jax.block_until_ready(out_bf16)
    np.testing.assert_allclose(np.asarray(out_bf16), np.asarray(ref), rtol=5e-2, atol=5e-2)

    print("KERNEL_OK")
</pallas_src>

<mosaic_0001>
module attributes {stable_mosaic.version = 11 : i64} {
  func.func @kernel(%arg0: i32, %arg1: memref<256x8xf32, #tpu.memory_space<vmem>>, %arg2: memref<256x8xf32, #tpu.memory_space<vmem>>, %arg3: memref<256x8xf32, #tpu.memory_space<vmem>>, %arg4: memref<256x8xf32, #tpu.memory_space<vmem>>, %arg5: memref<8x128xf32, #tpu.memory_space<vmem>>, %arg6: memref<8x128xf32, #tpu.memory_space<vmem>>, %arg7: memref<8x128xf32, #tpu.memory_space<vmem>>, %arg8: memref<8x128xf32, #tpu.memory_space<vmem>>, %arg9: memref<1x128xf32, #tpu.memory_space<vmem>>, %arg10: memref<128x128xf32, #tpu.memory_space<vmem>>, %arg11: memref<1x128xf32, #tpu.memory_space<vmem>>, %arg12: memref<128x128xf32, #tpu.memory_space<vmem>>, %arg13: memref<1x128xf32, #tpu.memory_space<vmem>>, %arg14: memref<256x128xf32, #tpu.memory_space<vmem>>) attributes {dimension_semantics = [#tpu.dimension_semantics<parallel>], iteration_bounds = array<i64: 2>, scalar_prefetch = 0 : i64, scratch_operands = 0 : i64, tpu.core_type = #tpu.core_type<tc>, window_params = [{transform_indices = @transform_0, window_bounds = array<i64: 256, 8>}, {transform_indices = @transform_1, window_bounds = array<i64: 256, 8>}, {transform_indices = @transform_2, window_bounds = array<i64: 256, 8>}, {transform_indices = @transform_3, window_bounds = array<i64: 256, 8>}, {pipeline_mode = #tpu.pipeline_mode<synchronous>, transform_indices = @transform_4, window_bounds = array<i64: 8, 128>}, {pipeline_mode = #tpu.pipeline_mode<synchronous>, transform_indices = @transform_5, window_bounds = array<i64: 8, 128>}, {pipeline_mode = #tpu.pipeline_mode<synchronous>, transform_indices = @transform_6, window_bounds = array<i64: 8, 128>}, {pipeline_mode = #tpu.pipeline_mode<synchronous>, transform_indices = @transform_7, window_bounds = array<i64: 8, 128>}, {pipeline_mode = #tpu.pipeline_mode<synchronous>, transform_indices = @transform_8, window_bounds = array<i64: 1, 128>}, {pipeline_mode = #tpu.pipeline_mode<synchronous>, transform_indices = @transform_9, window_bounds = array<i64: 128, 128>}, {pipeline_mode = #tpu.pipeline_mode<synchronous>, transform_indices = @transform_10, window_bounds = array<i64: 1, 128>}, {pipeline_mode = #tpu.pipeline_mode<synchronous>, transform_indices = @transform_11, window_bounds = array<i64: 128, 128>}, {pipeline_mode = #tpu.pipeline_mode<synchronous>, transform_indices = @transform_12, window_bounds = array<i64: 1, 128>}, {transform_indices = @transform_13, window_bounds = array<i64: 256, 128>}]} {
    %c0 = arith.constant 0 : index
    %c0_0 = arith.constant 0 : index
    %0 = vector.load %arg1[%c0, %c0_0] : memref<256x8xf32, #tpu.memory_space<vmem>>, vector<256x8xf32>
    %c0_1 = arith.constant 0 : index
    %c0_2 = arith.constant 0 : index
    %1 = vector.load %arg5[%c0_1, %c0_2] : memref<8x128xf32, #tpu.memory_space<vmem>>, vector<8x128xf32>
    %cst = arith.constant dense<0.000000e+00> : vector<256x128xf32>
    %2 = tpu.matmul %0, %1, %cst {dimension_numbers = #tpu.dot_dimension_numbers<[1], [0], [0], [1], [0, 0, 1, 1], [], []>} : vector<256x8xf32>, vector<8x128xf32>, vector<256x128xf32> -> vector<256x128xf32>
    %c0_3 = arith.constant 0 : index
    %c0_4 = arith.constant 0 : index
    %3 = vector.load %arg2[%c0_3, %c0_4] : memref<256x8xf32, #tpu.memory_space<vmem>>, vector<256x8xf32>
    %c0_5 = arith.constant 0 : index
    %c0_6 = arith.constant 0 : index
    %4 = vector.load %arg6[%c0_5, %c0_6] : memref<8x128xf32, #tpu.memory_space<vmem>>, vector<8x128xf32>
    %cst_7 = arith.constant dense<0.000000e+00> : vector<256x128xf32>
    %5 = tpu.matmul %3, %4, %cst_7 {dimension_numbers = #tpu.dot_dimension_numbers<[1], [0], [0], [1], [0, 0, 1, 1], [], []>} : vector<256x8xf32>, vector<8x128xf32>, vector<256x128xf32> -> vector<256x128xf32>
    %6 = arith.addf %2, %5 : vector<256x128xf32>
    %c0_8 = arith.constant 0 : index
    %c0_9 = arith.constant 0 : index
    %7 = vector.load %arg3[%c0_8, %c0_9] : memref<256x8xf32, #tpu.memory_space<vmem>>, vector<256x8xf32>
    %c0_10 = arith.constant 0 : index
    %c0_11 = arith.constant 0 : index
    %8 = vector.load %arg7[%c0_10, %c0_11] : memref<8x128xf32, #tpu.memory_space<vmem>>, vector<8x128xf32>
    %cst_12 = arith.constant dense<0.000000e+00> : vector<256x128xf32>
    %9 = tpu.matmul %7, %8, %cst_12 {dimension_numbers = #tpu.dot_dimension_numbers<[1], [0], [0], [1], [0, 0, 1, 1], [], []>} : vector<256x8xf32>, vector<8x128xf32>, vector<256x128xf32> -> vector<256x128xf32>
    %10 = arith.addf %6, %9 : vector<256x128xf32>
    %c0_13 = arith.constant 0 : index
    %c0_14 = arith.constant 0 : index
    %11 = vector.load %arg4[%c0_13, %c0_14] : memref<256x8xf32, #tpu.memory_space<vmem>>, vector<256x8xf32>
    %c0_15 = arith.constant 0 : index
    %c0_16 = arith.constant 0 : index
    %12 = vector.load %arg8[%c0_15, %c0_16] : memref<8x128xf32, #tpu.memory_space<vmem>>, vector<8x128xf32>
    %cst_17 = arith.constant dense<0.000000e+00> : vector<256x128xf32>
    %13 = tpu.matmul %11, %12, %cst_17 {dimension_numbers = #tpu.dot_dimension_numbers<[1], [0], [0], [1], [0, 0, 1, 1], [], []>} : vector<256x8xf32>, vector<8x128xf32>, vector<256x128xf32> -> vector<256x128xf32>
    %14 = arith.addf %10, %13 : vector<256x128xf32>
    %c0_18 = arith.constant 0 : index
    %c0_19 = arith.constant 0 : index
    %15 = vector.load %arg9[%c0_18, %c0_19] : memref<1x128xf32, #tpu.memory_space<vmem>>, vector<1x128xf32>
    %16 = vector.broadcast %15 : vector<1x128xf32> to vector<256x128xf32>
    %17 = arith.addf %14, %16 : vector<256x128xf32>
    %cst_20 = arith.constant 0.000000e+00 : f32
    %18 = vector.broadcast %cst_20 : f32 to vector<256x128xf32>
    %19 = arith.maximumf %17, %18 : vector<256x128xf32>
    %c0_21 = arith.constant 0 : index
    %c0_22 = arith.constant 0 : index
    %20 = vector.load %arg10[%c0_21, %c0_22] : memref<128x128xf32, #tpu.memory_space<vmem>>, vector<128x128xf32>
    %cst_23 = arith.constant dense<0.000000e+00> : vector<256x128xf32>
    %21 = tpu.matmul %19, %20, %cst_23 {dimension_numbers = #tpu.dot_dimension_numbers<[1], [0], [0], [1], [0, 0, 1, 1], [], []>} : vector<256x128xf32>, vector<128x128xf32>, vector<256x128xf32> -> vector<256x128xf32>
    %c0_24 = arith.constant 0 : index
    %c0_25 = arith.constant 0 : index
    %22 = vector.load %arg11[%c0_24, %c0_25] : memref<1x128xf32, #tpu.memory_space<vmem>>, vector<1x128xf32>
    %23 = vector.broadcast %22 : vector<1x128xf32> to vector<256x128xf32>
    %24 = arith.addf %21, %23 : vector<256x128xf32>
    %cst_26 = arith.constant 0.000000e+00 : f32
    %25 = vector.broadcast %cst_26 : f32 to vector<256x128xf32>
    %26 = arith.maximumf %24, %25 : vector<256x128xf32>
    %c0_27 = arith.constant 0 : index
    %c0_28 = arith.constant 0 : index
    %27 = vector.load %arg12[%c0_27, %c0_28] : memref<128x128xf32, #tpu.memory_space<vmem>>, vector<128x128xf32>
    %cst_29 = arith.constant dense<0.000000e+00> : vector<256x128xf32>
    %28 = tpu.matmul %26, %27, %cst_29 {dimension_numbers = #tpu.dot_dimension_numbers<[1], [0], [0], [1], [0, 0, 1, 1], [], []>} : vector<256x128xf32>, vector<128x128xf32>, vector<256x128xf32> -> vector<256x128xf32>
    %c0_30 = arith.constant 0 : index
    %c0_31 = arith.constant 0 : index
    %29 = vector.load %arg13[%c0_30, %c0_31] : memref<1x128xf32, #tpu.memory_space<vmem>>, vector<1x128xf32>
    %30 = vector.broadcast %29 : vector<1x128xf32> to vector<256x128xf32>
    %31 = arith.addf %28, %30 : vector<256x128xf32>
    %c0_32 = arith.constant 0 : index
    %c0_33 = arith.constant 0 : index
    %32 = vector.load %arg14[%c0_32, %c0_33] : memref<256x128xf32, #tpu.memory_space<vmem>>, vector<256x128xf32>
    tpu.vector_store %arg14[%c0_32, %c0_33], %31 {strides = array<i32>} : memref<256x128xf32, #tpu.memory_space<vmem>>, vector<256x128xf32>,
    return
  }
  func.func @transform_0(%arg0: i32) -> (i32, i32) {
    %c0_i32 = arith.constant 0 : i32
    %c0_i32_0 = arith.constant 0 : i32
    return %arg0, %c0_i32 : i32, i32
  }
  func.func @transform_1(%arg0: i32) -> (i32, i32) {
    %c0_i32 = arith.constant 0 : i32
    %c0_i32_0 = arith.constant 0 : i32
    return %arg0, %c0_i32 : i32, i32
  }
  func.func @transform_2(%arg0: i32) -> (i32, i32) {
    %c0_i32 = arith.constant 0 : i32
    %c0_i32_0 = arith.constant 0 : i32
    return %arg0, %c0_i32 : i32, i32
  }
  func.func @transform_3(%arg0: i32) -> (i32, i32) {
    %c0_i32 = arith.constant 0 : i32
    %c0_i32_0 = arith.constant 0 : i32
    return %arg0, %c0_i32 : i32, i32
  }
  func.func @transform_4(%arg0: i32) -> (i32, i32) {
    %c0_i32 = arith.constant 0 : i32
    %c0_i32_0 = arith.constant 0 : i32
    %c0_i32_1 = arith.constant 0 : i32
    return %c0_i32, %c0_i32_0 : i32, i32
  }
  func.func @transform_5(%arg0: i32) -> (i32, i32) {
    %c0_i32 = arith.constant 0 : i32
    %c0_i32_0 = arith.constant 0 : i32
    %c0_i32_1 = arith.constant 0 : i32
    return %c0_i32, %c0_i32_0 : i32, i32
  }
  func.func @transform_6(%arg0: i32) -> (i32, i32) {
    %c0_i32 = arith.constant 0 : i32
    %c0_i32_0 = arith.constant 0 : i32
    %c0_i32_1 = arith.constant 0 : i32
    return %c0_i32, %c0_i32_0 : i32, i32
  }
  func.func @transform_7(%arg0: i32) -> (i32, i32) {
    %c0_i32 = arith.constant 0 : i32
    %c0_i32_0 = arith.constant 0 : i32
    %c0_i32_1 = arith.constant 0 : i32
    return %c0_i32, %c0_i32_0 : i32, i32
  }
  func.func @transform_8(%arg0: i32) -> (i32, i32) {
    %c0_i32 = arith.constant 0 : i32
    %c0_i32_0 = arith.constant 0 : i32
    %c0_i32_1 = arith.constant 0 : i32
    return %c0_i32, %c0_i32_0 : i32, i32
  }
  func.func @transform_9(%arg0: i32) -> (i32, i32) {
    %c0_i32 = arith.constant 0 : i32
    %c0_i32_0 = arith.constant 0 : i32
    %c0_i32_1 = arith.constant 0 : i32
    return %c0_i32, %c0_i32_0 : i32, i32
  }
  func.func @transform_10(%arg0: i32) -> (i32, i32) {
    %c0_i32 = arith.constant 0 : i32
    %c0_i32_0 = arith.constant 0 : i32
    %c0_i32_1 = arith.constant 0 : i32
    return %c0_i32, %c0_i32_0 : i32, i32
  }
  func.func @transform_11(%arg0: i32) -> (i32, i32) {
    %c0_i32 = arith.constant 0 : i32
    %c0_i32_0 = arith.constant 0 : i32
    %c0_i32_1 = arith.constant 0 : i32
    return %c0_i32, %c0_i32_0 : i32, i32
  }
  func.func @transform_12(%arg0: i32) -> (i32, i32) {
    %c0_i32 = arith.constant 0 : i32
    %c0_i32_0 = arith.constant 0 : i32
    %c0_i32_1 = arith.constant 0 : i32
    return %c0_i32, %c0_i32_0 : i32, i32
  }
  func.func @transform_13(%arg0: i32) -> (i32, i32) {
    %c0_i32 = arith.constant 0 : i32
    %c0_i32_0 = arith.constant 0 : i32
    return %arg0, %c0_i32 : i32, i32
  }
}

</mosaic_0001>

<bundles_post_ra>
// kernel: tpu_custom_call.1
= control target key start
LH: loop header
LB: loop body
LE: loop exit
PB: predicated region body
PF: predicated region fallthrough
CT: control target
= control target key end

     0   :  { %s4529_s0 = inlined_call_operand.vmem [shape: f32[512,8], index: 0, kind: input, shape index: {}]   ;;  %s4530_s1 = inlined_call_operand.vmem [shape: f32[512,8], index: 1, kind: input, shape index: {}]   ;;  %s4531_s2 = inlined_call_operand.vmem [shape: f32[512,8], index: 2, kind: input, shape index: {}]   ;;  %s4532_s3 = inlined_call_operand.vmem [shape: f32[512,8], index: 3, kind: input, shape index: {}]   ;;  %s4533_s4 = inlined_call_operand.vmem [shape: f32[8,128], index: 4, kind: input, shape index: {}]   ;;  %s4534_s5 = inlined_call_operand.vmem [shape: f32[8,128], index: 5, kind: input, shape index: {}]   ;;  %s4535_s6 = inlined_call_operand.vmem [shape: f32[8,128], index: 6, kind: input, shape index: {}]   ;;  %s4536_s7 = inlined_call_operand.vmem [shape: f32[8,128], index: 7, kind: input, shape index: {}]   ;;  %s4537_s8 = inlined_call_operand.vmem [shape: f32[1,128], index: 8, kind: input, shape index: {}]   ;;  %s4538_s9 = inlined_call_operand.vmem [shape: f32[128,128], index: 9, kind: input, shape index: {}]   ;;  %s4539_s10 = inlined_call_operand.vmem [shape: f32[1,128], index: 10, kind: input, shape index: {}]   ;;  %s4540_s11 = inlined_call_operand.vmem [shape: f32[128,128], index: 11, kind: input, shape index: {}]   ;;  %s4541_s12 = inlined_call_operand.vmem [shape: f32[1,128], index: 12, kind: input, shape index: {}]   ;;  %s4542_s13 = inlined_call_operand.hbm [shape: f32[512,128], index: 13, kind: output, shape index: {}]  }
   0x1   :  { %4543 = sst [smem:[#allocation5_spill]] %s4529_s0 }
   0x2   :  { %4544 = sst [smem:[#allocation6_spill]] %s4530_s1 }
   0x3   :  { %4545 = sst [smem:[#allocation7_spill]] %s4533_s4 }
   0x4   :  { %18 = vsyncpa [#allocation3], 0 }
   0x5   :  { %20 = vsyncpa [#allocation3 + $0x1], 0  ;;  %s3808_s25 = smov 0   ;;  %s3810_s26 = smov 0  }
   0x6   :  { %s3812_s27 = smov 0   ;;  %s3814_s28 = smov 0  }
   0x7 LB: > { %s3829_s29 = sadd.s32 4294967295, %s3733_s28   ;;  %s2732_s30 = sadd.s32 4294967294, %s3733_s28   ;;  %s3733_s28 = sphi %s3814_s28, %s4554_s28   ;;  %s3729_s27 = sphi %s3812_s27, %s4553_s27   ;;  %s3725_s26 = sphi %s3810_s26, %s4552_s26   ;;  %s3721_s25 = sphi %s3808_s25, %s4551_s25  }
   0x8   : > { %s3833_s14 = sadd.s32 1, %s3733_s28   ;;  %s326_s15 = sadd.s32 1, %s3729_s27 }
   0x9   : > { %s323_s16 = ssub.s32 %s3733_s28, %s3833_s14  ;;  %p336_p0 = scmp.ne.s32.totalorder %s3729_s27, %s3725_s26 }
   0xa   : > { %p324_p1 = scmp.eq.s32.totalorder %s323_s16, 0  ;;  %p337_p2 = scmp.eq.s32.totalorder %s3829_s29, 1 }
   0xb   : > { %p342_p3 = scmp.ne.s32.totalorder %s3725_s26, %s3721_s25  ;;  %p343_p4 = scmp.eq.s32.totalorder %s2732_s30, 1 }
   0xc   : > { %s3844_s17 = scalar_select %p324_p1, %s3729_s27, %s326_s15  }
   0xd   : > { %p3846_p5 = por %p337_p2, %p336_p0  ;;  %p3850_p6 = por %p343_p4, %p342_p3 }
   0xe   : > { %p2735_p7 = scmp.ge.s32.totalorder %s3733_s28, 1  ;;  %p424_p8 = scmp.lt.s32.totalorder %s3733_s28, 3 }
  0x10   : > { %p425_p9 = pnand %p2735_p7, %p424_p8 }
  0x11   : > { %s4548_s4 = sld [smem:[#allocation7_spill]] (!%p425_p9)  ;;  %s2737_s22 = sshll.u32 (!%p425_p9), %s3829_s29, 5  ;;  %v1249_v1 = vld [vmem:[%s4535_s6] sm:$0xff] (!%p425_p9)  ;;  %vm574_vm0 = vcmask (!%p425_p9), 64512   ;;  %v2061_v61 = vld [vmem:[%s4538_s9 + $0x8] sm:$0xff] (!%p425_p9)  ;;  %v2062_v62 = vld [vmem:[%s4538_s9 + $0x10] sm:$0xff] (!%p425_p9) }
  0x12   : > { %428 = sbr.rel (%p425_p9) target bundleno = 886 (0x376), region = 72  ;;  %p484_p10 = scmp.lt.s32.totalorder (!%p425_p9), %s2737_s22, 63  ;;  %v573_v2 = vld [vmem:[%s4534_s5] sm:$0xff] (!%p425_p9) }
  0x13   : > { %s4549_s0 = sld [smem:[#allocation5_spill]] (!%p425_p9)  ;;  %3110 = vmatprep.subr.mxu1 (!%p425_p9), %v573_v2  ;;  %v3881_v6 = vld [vmem:[%s4536_s7] sm:$0xff] (!%p425_p9)  ;;  %s4550_s1 = sld [smem:[#allocation6_spill]] (!%p425_p9) }
  0x14   : > { %3111 = vmatpush3.msra.mxu1 (!%p425_p9), %v573_v2  ;;  %v2060_v60 = vld [vmem:[%s4538_s9] sm:$0xff] (!%p425_p9)  ;;  %s480_s20 = sand.u32 (!%p425_p9), 1, %s3725_s26  }
  0x17   : > { %v540_v0 = vld [vmem:[%s4548_s4] sm:$0xff] (!%p425_p9) }
  0x18   : > { %3160 = vmatprep.subr.mxu0 (!%p425_p9), %v540_v0 }
  0x19   : > { %3161 = vmatpush3.msra.mxu0 %v540_v0  ;;  %s4556_s22 = smov (!%p484_p10, %s2737_s22), 63  ;;  %v3470_v0 = vpack.c.bf16 %v2061_v61, %v2060_v60 }
  0x1a   : > { %3210 = vmatprep.subr.mxu0 %v1249_v1  ;;  %s3863_s30 = sshll.u32 %s4556_s22, 3 }
  0x1b   : > { %s3872_s4 = scalar_lea.vmem %s4549_s0, %s3863_s30  ;;  %s3905_s16 = scalar_lea.vmem %s4550_s1, %s3863_s30  ;;  %3471 = vmatprep.subr.bf16.mxu1 %v3470_v0 }
  0x1c   : > { %v508_v3 = vld [vmem:[%s3872_s4] sm:$0xff]  ;;  %v509_v4 = vld [vmem:[%s3872_s4 + $0x8] sm:$0xff]  ;;  %v510_v5 = vld [vmem:[%s3872_s4 + $0x10] sm:$0xff]  ;;  %s3989_s22 = scalar_lea.vmem %s4531_s2, %s3863_s30  ;;  %s4127_s1 = scalar_lea.vmem %s4532_s3, %s3863_s30 }
  0x1d   : > { %3162 = vmatprep.mubr.msk.f32.mxu0 %vm574_vm0, %v508_v3  ;;  %v511_v7 = vld [vmem:[%s3872_s4 + $0x18] sm:$0xff]  ;;  %v512_v8 = vld [vmem:[%s3872_s4 + $0x20] sm:$0xff]  ;;  %v513_v9 = vld [vmem:[%s3872_s4 + $0x28] sm:$0xff] }
  0x1e   : > { %3163 = vmatmul.mubr.msk.f32.vlgmr.msra.gmra.mrb[0].mxu0 %vm574_vm0, %v509_v4  ;;  %v514_v10 = vld [vmem:[%s3872_s4 + $0x30] sm:$0xff]  ;;  %v515_v11 = vld [vmem:[%s3872_s4 + $0x38] sm:$0xff]  ;;  %v516_v12 = vld [vmem:[%s3872_s4 + $0x40] sm:$0xff] }
  0x1f   : > { %3211 = vmatpush3.msra.mxu0 %v1249_v1  ;;  %3165 = vmatprep.mubr.msk.f32.mxu0 %vm574_vm0, %v510_v5  ;;  %v517_v13 = vld [vmem:[%s3872_s4 + $0x48] sm:$0xff]  ;;  %v518_v14 = vld [vmem:[%s3872_s4 + $0x50] sm:$0xff]  ;;  %v519_v15 = vld [vmem:[%s3872_s4 + $0x58] sm:$0xff] }
  0x20   : > { %3260 = vmatprep.subr.mxu0 %v3881_v6  ;;  %v520_v16 = vld [vmem:[%s3872_s4 + $0x60] sm:$0xff]  ;;  %v542_v18 = vld [vmem:[%s3905_s16 + $0x8] sm:$0xff]  ;;  %v543_v19 = vld [vmem:[%s3905_s16 + $0x10] sm:$0xff] }
  0x21   : > { %v541_v17 = vld [vmem:[%s3905_s16] sm:$0xff]  ;;  %v521_v20 = vld [vmem:[%s3872_s4 + $0x68] sm:$0xff]  ;;  %v522_v21 = vld [vmem:[%s3872_s4 + $0x70] sm:$0xff] }
  0x22   : > { %3166 = vmatmul.mubr.msk.f32.gmra.mrb[2].mxu0 %vm574_vm0, %v511_v7  ;;  %3112 = vmatprep.mubr.msk.f32.mxu1 %vm574_vm0, %v541_v17  ;;  %v544_v22 = vld [vmem:[%s3905_s16 + $0x18] sm:$0xff]  ;;  %v545_v23 = vld [vmem:[%s3905_s16 + $0x20] sm:$0xff]  ;;  %v546_v26 = vld [vmem:[%s3905_s16 + $0x28] sm:$0xff] }
  0x23   : > { %3168 = vmatprep.mubr.msk.f32.mxu0 %vm574_vm0, %v512_v8  ;;  %3113 = vmatmul.mubr.msk.f32.vlgmr.msra.gmra.mrb[0].mxu1 %vm574_vm0, %v542_v18  ;;  %v523_v24 = vld [vmem:[%s3872_s4 + $0x78] sm:$0xff]  ;;  %v524_v25 = vld [vmem:[%s3872_s4 + $0x80] sm:$0xff]  ;;  %v547_v27 = vld [vmem:[%s3905_s16 + $0x30] sm:$0xff] }
  0x24   : > { %3115 = vmatprep.mubr.msk.f32.mxu1 %vm574_vm0, %v543_v19  ;;  %v525_v28 = vld [vmem:[%s3872_s4 + $0x88] sm:$0xff]  ;;  %v526_v29 = vld [vmem:[%s3872_s4 + $0x90] sm:$0xff]  ;;  %v548_v30 = vld [vmem:[%s3905_s16 + $0x38] sm:$0xff]  ;;  %3473 = vmatpush3.bf16.msra.mxu1 %v3470_v0 }
  0x25   : > { %v549_v31 = vld [vmem:[%s3905_s16 + $0x40] sm:$0xff]  ;;  %v527_v32 = vld [vmem:[%s3872_s4 + $0x98] sm:$0xff]  ;;  %v550_v34 = vld [vmem:[%s3905_s16 + $0x48] sm:$0xff] }
  0x26   : > { %3169 = vmatmul.mubr.msk.f32.gmra.mrb[4].mxu0 %vm574_vm0, %v513_v9  ;;  %v528_v33 = vld [vmem:[%s3872_s4 + $0xa0] sm:$0xff]  ;;  %v551_v35 = vld [vmem:[%s3905_s16 + $0x50] sm:$0xff]  ;;  %v529_v36 = vld [vmem:[%s3872_s4 + $0xa8] sm:$0xff] }
  0x27   : > { %3171 = vmatprep.mubr.msk.f32.mxu0 %vm574_vm0, %v514_v10  ;;  %3116 = vmatmul.mubr.msk.f32.gmra.mrb[2].mxu1 %vm574_vm0, %v544_v22  ;;  %v530_v37 = vld [vmem:[%s3872_s4 + $0xb0] sm:$0xff]  ;;  %v552_v38 = vld [vmem:[%s3905_s16 + $0x58] sm:$0xff]  ;;  %v553_v39 = vld [vmem:[%s3905_s16 + $0x60] sm:$0xff] }
  0x28   : > { %3118 = vmatprep.mubr.msk.f32.mxu1 %vm574_vm0, %v545_v23  ;;  %v531_v40 = vld [vmem:[%s3872_s4 + $0xb8] sm:$0xff]  ;;  %v532_v41 = vld [vmem:[%s3872_s4 + $0xc0] sm:$0xff]  ;;  %v554_v42 = vld [vmem:[%s3905_s16 + $0x68] sm:$0xff] }
  0x29   : > { %v555_v43 = vld [vmem:[%s3905_s16 + $0x70] sm:$0xff]  ;;  %v533_v44 = vld [vmem:[%s3872_s4 + $0xc8] sm:$0xff]  ;;  %v556_v46 = vld [vmem:[%s3905_s16 + $0x78] sm:$0xff] }
  0x2a   : > { %3172 = vmatmul.mubr.msk.f32.gmra.mrb[6].mxu0 %vm574_vm0, %v515_v11  ;;  %v534_v45 = vld [vmem:[%s3872_s4 + $0xd0] sm:$0xff]  ;;  %v557_v47 = vld [vmem:[%s3905_s16 + $0x80] sm:$0xff]  ;;  %v535_v48 = vld [vmem:[%s3872_s4 + $0xd8] sm:$0xff] }
  0x2b   : > { %3174 = vmatprep.mubr.msk.f32.mxu0 %vm574_vm0, %v516_v12  ;;  %3119 = vmatmul.mubr.msk.f32.gmra.mrb[4].mxu1 %vm574_vm0, %v546_v26  ;;  %v536_v49 = vld [vmem:[%s3872_s4 + $0xe0] sm:$0xff]  ;;  %v558_v50 = vld [vmem:[%s3905_s16 + $0x88] sm:$0xff]  ;;  %v559_v51 = vld [vmem:[%s3905_s16 + $0x90] sm:$0xff] }
  0x2c   : > { %3121 = vmatprep.mubr.msk.f32.mxu1 %vm574_vm0, %v547_v27  ;;  %v537_v52 = vld [vmem:[%s3872_s4 + $0xe8] sm:$0xff]  ;;  %v538_v53 = vld [vmem:[%s3872_s4 + $0xf0] sm:$0xff]  ;;  %v560_v54 = vld [vmem:[%s3905_s16 + $0x98] sm:$0xff] }
  0x2d   : > { %v561_v55 = vld [vmem:[%s3905_s16 + $0xa0] sm:$0xff]  ;;  %v539_v56 = vld [vmem:[%s3872_s4 + $0xf8] sm:$0xff]  ;;  %v562_v58 = vld [vmem:[%s3905_s16 + $0xa8] sm:$0xff] }
  0x2e   : > { %3175 = vmatmul.mubr.msk.f32.gmra.mrb[8].mxu0 %vm574_vm0, %v517_v13  ;;  %v1217_v57 = vld [vmem:[%s3989_s22] sm:$0xff]  ;;  %v563_v59 = vld [vmem:[%s3905_s16 + $0xb0] sm:$0xff]  ;;  %v1218_v63 = vld [vmem:[%s3989_s22 + $0x8] sm:$0xff] }
  0x2f   : > { %3177 = vmatprep.mubr.msk.f32.mxu0 %vm574_vm0, %v518_v14  ;;  %3122 = vmatmul.mubr.msk.f32.gmra.mrb[6].mxu1 %vm574_vm0, %v548_v30  ;;  %v2063_v1 = vld [vmem:[%s4538_s9 + $0x18] sm:$0xff]  ;;  %v1219_v2 = vld [vmem:[%s3989_s22 + $0x10] sm:$0xff]  ;;  %v2064_v4 = vld [vmem:[%s4538_s9 + $0x20] sm:$0xff] }
  0x30   : > { %3124 = vmatprep.mubr.msk.f32.mxu1 %vm574_vm0, %v549_v31  ;;  %v3474_v3 = vpack.c.bf16 %v2063_v1, %v2062_v62  ;;  %v2065_v5 = vld [vmem:[%s4538_s9 + $0x28] sm:$0xff]  ;;  %v564_v7 = vld [vmem:[%s3905_s16 + $0xb8] sm:$0xff]  ;;  %v565_v8 = vld [vmem:[%s3905_s16 + $0xc0] sm:$0xff] }
  0x31   : > { %v1220_v9 = vld [vmem:[%s3989_s22 + $0x18] sm:$0xff]  ;;  %v3478_v10 = vpack.c.bf16 %v2065_v5, %v2064_v4  ;;  %v1221_v11 = vld [vmem:[%s3989_s22 + $0x20] sm:$0xff]  ;;  %v2066_v12 = vld [vmem:[%s4538_s9 + $0x30] sm:$0xff] }
  0x32   : > { %3178 = vmatmul.mubr.msk.f32.gmra.mrb[10].mxu0 %vm574_vm0, %v519_v15  ;;  %3475 = vmatprep.subr.bf16.mxu1 %v3474_v3  ;;  %v2067_v13 = vld [vmem:[%s4538_s9 + $0x38] sm:$0xff]  ;;  %v567_v14 = vld [vmem:[%s3905_s16 + $0xd0] sm:$0xff]  ;;  %v1222_v15 = vld [vmem:[%s3989_s22 + $0x28] sm:$0xff] }
  0x33   : > { %3180 = vmatprep.mubr.msk.f32.mxu0 %vm574_vm0, %v520_v16  ;;  %3125 = vmatmul.mubr.msk.f32.gmra.mrb[8].mxu1 %vm574_vm0, %v550_v34  ;;  %v3482_v16 = vpack.c.bf16 %v2067_v13, %v2066_v12  ;;  %v1223_v17 = vld [vmem:[%s3989_s22 + $0x30] sm:$0xff]  ;;  %v2068_v18 = vld [vmem:[%s4538_s9 + $0x40] sm:$0xff]  ;;  %v2069_v19 = vld [vmem:[%s4538_s9 + $0x48] sm:$0xff] }
  0x34   : > { %3127 = vmatprep.mubr.msk.f32.mxu1 %vm574_vm0, %v551_v35  ;;  %3477 = vmatpush3.bf16.msra.mxu1 %v3474_v3  ;;  %v1224_v22 = vld [vmem:[%s3989_s22 + $0x38] sm:$0xff]  ;;  %v3486_v23 = vpack.c.bf16 %v2069_v19, %v2068_v18  ;;  %v570_v27 = vld [vmem:[%s3905_s16 + $0xe8] sm:$0xff]  ;;  %v1227_v31 = vld [vmem:[%s3989_s22 + $0x50] sm:$0xff] }
  0x35   : > { %3479 = vmatprep.subr.bf16.mxu1 %v3478_v10  ;;  %v2071_v26 = vld [vmem:[%s4538_s9 + $0x58] sm:$0xff]  ;;  %v1607_v61 = vld [vmem:[%s4127_s1 + $0x20] sm:$0xff]  ;;  %v1608_v62 = vld [vmem:[%s4127_s1 + $0x28] sm:$0xff] }
  0x36   : > { %3181 = vmatmul.mubr.msk.f32.gmra.mrb[12].mxu0 %vm574_vm0, %v521_v20  ;;  %v568_v20 = vld [vmem:[%s3905_s16 + $0xd8] sm:$0xff]  ;;  %v1611_v1 = vld [vmem:[%s4127_s1 + $0x40] sm:$0xff]  ;;  %v1613_v3 = vld [vmem:[%s4127_s1 + $0x50] sm:$0xff] }
  0x37   : > { %3183 = vmatprep.mubr.msk.f32.mxu0 %vm574_vm0, %v522_v21  ;;  %3128 = vmatmul.mubr.msk.f32.gmra.mrb[10].mxu1 %vm574_vm0, %v552_v38  ;;  %v569_v21 = vld [vmem:[%s3905_s16 + $0xe0] sm:$0xff]  ;;  %v572_v34 = vld [vmem:[%s3905_s16 + $0xf8] sm:$0xff]  ;;  %v1230_v38 = vld [vmem:[%s3989_s22 + $0x68] sm:$0xff] }
  0x38   : > { %3130 = vmatprep.mubr.msk.f32.mxu1 %vm574_vm0, %v553_v39  ;;  %3481 = vmatpush3.bf16.msra.mxu1 %v3478_v10  ;;  %v1228_v35 = vld [vmem:[%s3989_s22 + $0x58] sm:$0xff]  ;;  %v1231_v39 = vld [vmem:[%s3989_s22 + $0x70] sm:$0xff]  ;;  %v1615_v5 = vld [vmem:[%s4127_s1 + $0x60] sm:$0xff] }
  0x39   : > { %3483 = vmatprep.subr.bf16.mxu1 %v3482_v16  ;;  %v1606_v60 = vld [vmem:[%s4127_s1 + $0x18] sm:$0xff]  ;;  %v1619_v10 = vld [vmem:[%s4127_s1 + $0x80] sm:$0xff]  ;;  %v1621_v12 = vld [vmem:[%s4127_s1 + $0x90] sm:$0xff] }
  0x3a   : > { %3184 = vmatmul.mubr.msk.f32.gmra.mrb[14].mxu0 %vm574_vm0, %v523_v24  ;;  %v1225_v24 = vld [vmem:[%s3989_s22 + $0x40] sm:$0xff]  ;;  %v1610_v0 = vld [vmem:[%s4127_s1 + $0x38] sm:$0xff]  ;;  %v1628_v18 = vld [vmem:[%s4127_s1 + $0xc8] sm:$0xff] }
  0x3b   : > { %3186 = vmatprep.mubr.msk.f32.mxu0 %vm574_vm0, %v524_v25  ;;  %3131 = vmatmul.mubr.msk.f32.gmra.mrb[12].mxu1 %vm574_vm0, %v554_v42  ;;  %v2070_v25 = vld [vmem:[%s4538_s9 + $0x50] sm:$0xff]  ;;  %v1234_v42 = vld [vmem:[%s3989_s22 + $0x88] sm:$0xff]  ;;  %v1614_v4 = vld [vmem:[%s4127_s1 + $0x58] sm:$0xff] }
  0x3c   : > { %3133 = vmatprep.mubr.msk.f32.mxu1 %vm574_vm0, %v555_v43  ;;  %3485 = vmatpush3.bf16.msra.mxu1 %v3482_v16  ;;  %v3490_v30 = vpack.c.bf16 %v2071_v26, %v2070_v25  ;;  %v1235_v43 = vld [vmem:[%s3989_s22 + $0x90] sm:$0xff]  ;;  %v1622_v13 = vld [vmem:[%s4127_s1 + $0x98] sm:$0xff] }
  0x3d   : > { %3487 = vmatprep.subr.bf16.mxu1 %v3486_v23  ;;  %v1626_v16 = vld [vmem:[%s4127_s1 + $0xb8] sm:$0xff]  ;;  %v1629_v19 = vld [vmem:[%s4127_s1 + $0xd0] sm:$0xff] }
  0x3e   : > { %3187 = vmatmul.mubr.msk.f32.gmra.mrb[16].mxu0 %vm574_vm0, %v525_v28  ;;  %v571_v28 = vld [vmem:[%s3905_s16 + $0xf0] sm:$0xff]  ;;  %v2075_v26 = vld [vmem:[%s4538_s9 + $0x78] sm:$0xff] }
  0x3f   : > { %3189 = vmatprep.mubr.msk.f32.mxu0 %vm574_vm0, %v526_v29  ;;  %3134 = vmatmul.mubr.msk.f32.gmra.mrb[14].mxu1 %vm574_vm0, %v556_v46  ;;  %v1226_v29 = vld [vmem:[%s3989_s22 + $0x48] sm:$0xff]  ;;  %v2074_v25 = vld [vmem:[%s4538_s9 + $0x70] sm:$0xff] }
  0x40   : > { %3136 = vmatprep.mubr.msk.f32.mxu1 %vm574_vm0, %v557_v47  ;;  %3489 = vmatpush3.bf16.msra.mxu1 %v3486_v23  ;;  %v1238_v46 = vld [vmem:[%s3989_s22 + $0xa8] sm:$0xff]  ;;  %v1239_v47 = vld [vmem:[%s3989_s22 + $0xb0] sm:$0xff] }
  0x41   : > { %3491 = vmatprep.subr.bf16.mxu1 %v3490_v30  ;;  %v1633_v23 = vld [vmem:[%s4127_s1 + $0xf0] sm:$0xff] }
  0x42   : > { %3190 = vmatmul.mubr.msk.f32.gmra.mrb[18].mxu0 %vm574_vm0, %v527_v32  ;;  %v2072_v32 = vld [vmem:[%s4538_s9 + $0x60] sm:$0xff] }
  0x43   : > { %3192 = vmatprep.mubr.msk.f32.mxu0 %vm574_vm0, %v528_v33  ;;  %3137 = vmatmul.mubr.msk.f32.gmra.mrb[16].mxu1 %vm574_vm0, %v558_v50  ;;  %v2073_v33 = vld [vmem:[%s4538_s9 + $0x68] sm:$0xff] }
  0x44   : > { %3139 = vmatprep.mubr.msk.f32.mxu1 %vm574_vm0, %v559_v51  ;;  %3493 = vmatpush3.bf16.msra.mxu1 %v3490_v30  ;;  %v1242_v50 = vld [vmem:[%s3989_s22 + $0xc8] sm:$0xff]  ;;  %v1243_v51 = vld [vmem:[%s3989_s22 + $0xd0] sm:$0xff] }
  0x46   : > { %3193 = vmatmul.mubr.msk.f32.gmra.mrb[20].mxu0 %vm574_vm0, %v529_v36  ;;  %v3494_v36 = vpack.c.bf16 %v2073_v33, %v2072_v32 }
  0x47   : > { %3195 = vmatprep.mubr.msk.f32.mxu0 %vm574_vm0, %v530_v37  ;;  %3140 = vmatmul.mubr.msk.f32.gmra.mrb[18].mxu1 %vm574_vm0, %v560_v54  ;;  %v1229_v37 = vld [vmem:[%s3989_s22 + $0x60] sm:$0xff]  ;;  %v1246_v54 = vld [vmem:[%s3989_s22 + $0xe8] sm:$0xff] }
  0x48   : > { %3142 = vmatprep.mubr.msk.f32.mxu1 %vm574_vm0, %v561_v55  ;;  %3495 = vmatprep.subr.bf16.mxu1 %v3494_v36  ;;  %v1247_v55 = vld [vmem:[%s3989_s22 + $0xf0] sm:$0xff] }
  0x49   : > { %3497 = vmatpush3.bf16.msra.mxu1 %v3494_v36 }
  0x4a   : > { %3196 = vmatmul.mubr.msk.f32.gmra.mrb[22].mxu0 %vm574_vm0, %v531_v40  ;;  %v1232_v40 = vld [vmem:[%s3989_s22 + $0x78] sm:$0xff] }
  0x4b   : > { %3198 = vmatprep.mubr.msk.f32.mxu0 %vm574_vm0, %v532_v41  ;;  %3143 = vmatmul.mubr.msk.f32.gmra.mrb[20].mxu1 %vm574_vm0, %v562_v58  ;;  %v1233_v41 = vld [vmem:[%s3989_s22 + $0x80] sm:$0xff]  ;;  %v1604_v58 = vld [vmem:[%s4127_s1 + $0x8] sm:$0xff] }
  0x4c   : > { %3145 = vmatprep.mubr.msk.f32.mxu1 %vm574_vm0, %v563_v59  ;;  %v1605_v59 = vld [vmem:[%s4127_s1 + $0x10] sm:$0xff] }
  0x4e   : > { %3199 = vmatmul.mubr.msk.f32.gmra.mrb[24].mxu0 %vm574_vm0, %v533_v44  ;;  %v1236_v44 = vld [vmem:[%s3989_s22 + $0x98] sm:$0xff] }
  0x4f   : > { %3201 = vmatprep.mubr.msk.f32.mxu0 %vm574_vm0, %v534_v45  ;;  %3146 = vmatmul.mubr.msk.f32.gmra.mrb[22].mxu1 %vm574_vm0, %v564_v7  ;;  %v1237_v45 = vld [vmem:[%s3989_s22 + $0xa0] sm:$0xff]  ;;  %v1616_v7 = vld [vmem:[%s4127_s1 + $0x68] sm:$0xff] }
  0x50   : > { %3148 = vmatprep.mubr.msk.f32.mxu1 %vm574_vm0, %v565_v8  ;;  %v1617_v8 = vld [vmem:[%s4127_s1 + $0x70] sm:$0xff] }
  0x52   : > { %3202 = vmatmul.mubr.msk.f32.gmra.mrb[26].mxu0 %vm574_vm0, %v535_v48  ;;  %v1240_v48 = vld [vmem:[%s3989_s22 + $0xb8] sm:$0xff] }
  0x53   : > { %3204 = vmatprep.mubr.msk.f32.mxu0 %vm574_vm0, %v536_v49  ;;  %v1241_v49 = vld [vmem:[%s3989_s22 + $0xc0] sm:$0xff] }
  0x56   : > { %3205 = vmatmul.mubr.msk.f32.gmra.mrb[28].mxu0 %vm574_vm0, %v537_v52  ;;  %v1244_v52 = vld [vmem:[%s3989_s22 + $0xd8] sm:$0xff] }
  0x57   : > { %3207 = vmatprep.mubr.msk.f32.mxu0 %vm574_vm0, %v538_v53  ;;  %v1245_v53 = vld [vmem:[%s3989_s22 + $0xe0] sm:$0xff] }
  0x5a   : > { %3208 = vmatmul.mubr.msk.f32.gmra.mrb[30].mxu0 %vm574_vm0, %v539_v56  ;;  %v1248_v56 = vld [vmem:[%s3989_s22 + $0xf8] sm:$0xff]  ;;  %s2881_s22 = sshll.u32 %s3829_s29, 12  ;;  %s4488_s29 = scalar_lea.sflag [#allocation3], %s480_s20 }
  0x5b   : > { %3212 = vmatprep.mubr.msk.f32.mxu0 %vm574_vm0, %v1217_v57  ;;  %v1603_v57 = vld [vmem:[%s4127_s1] sm:$0xff]  ;;  %s4479_s24 = scalar_lea.hbm %s4542_s13, %s2881_s22 }
  0x5e   : > { %3213 = vmatmul.mubr.msk.f32.vlgmr.msra.gmra.mrb[0].mxu0 %vm574_vm0, %v1218_v63  ;;  %v1609_v63 = vld [vmem:[%s4127_s1 + $0x30] sm:$0xff] }
  0x5f   : > { %3261 = vmatpush3.msra.mxu0 %v3881_v6  ;;  %3215 = vmatprep.mubr.msk.f32.mxu0 %vm574_vm0, %v1219_v2  ;;  %v566_v6 = vld [vmem:[%s3905_s16 + $0xc8] sm:$0xff]  ;;  %s2736_s16 = sshll.u32 %s480_s20, 8 }
  0x60   : > { %3149 = vmatmul.mubr.msk.f32.gmra.mrb[24].mxu1 %vm574_vm0, %v566_v6  ;;  %v1612_v2 = vld [vmem:[%s4127_s1 + $0x48] sm:$0xff]  ;;  %v1623_v6 = vld [vmem:[%s4127_s1 + $0xa0] sm:$0xff]  ;;  %s4413_s30 = scalar_lea.vmem [#allocation2], %s2736_s16  ;;  %s3735_s16 = smov [#allocation2]  }
  0x61   : > { %3151 = vmatprep.mubr.msk.f32.mxu1 %vm574_vm0, %v567_v14  ;;  %v1624_v14 = vld [vmem:[%s4127_s1 + $0xa8] sm:$0xff]  ;;  %s2634_s4 = sshll.u32 %s4413_s30, 4  ;;  %s3675_s0 = sshll.u32 %s3735_s16, 4  ;;  %s4481_s4 = int_to_ptr.vmem [resolvable:$true] %s2634_s4  ;;  %s3676_s0 = int_to_ptr.vmem [resolvable:$false] %s3675_s0 }
  0x62   : > { %3216 = vmatmul.mubr.msk.f32.gmra.mrb[2].mxu0 %vm574_vm0, %v1220_v9  ;;  %v1618_v9 = vld [vmem:[%s4127_s1 + $0x78] sm:$0xff]  ;;  %s3671_s15 = scalar_lea.vmem %s4481_s4, 4096  ;;  %p3678_p0 = scmp.lt.s32.totalorder %s4481_s4, %s3676_s0 }
  0x63   : > { %3218 = vmatprep.mubr.msk.f32.mxu0 %vm574_vm0, %v1221_v11  ;;  %v1620_v11 = vld [vmem:[%s4127_s1 + $0x88] sm:$0xff]  ;;  %p3672_p11 = scmp.ne.s32.totalorder %s4481_s4, %s3671_s15 }
  0x64   : > { %3152 = vmatmul.mubr.msk.f32.gmra.mrb[26].mxu1 %vm574_vm0, %v568_v20  ;;  %v1630_v20 = vld [vmem:[%s4127_s1 + $0xd8] sm:$0xff] }
  0x65   : > { %3154 = vmatprep.mubr.msk.f32.mxu1 %vm574_vm0, %v569_v21  ;;  %v1631_v21 = vld [vmem:[%s4127_s1 + $0xe0] sm:$0xff]  ;;  %p3673_p12 = pnand %p3672_p11, %p3846_p5 }
  0x66   : > { %3219 = vmatmul.mubr.msk.f32.gmra.mrb[4].mxu0 %vm574_vm0, %v1222_v15  ;;  %v1625_v15 = vld [vmem:[%s4127_s1 + $0xb0] sm:$0xff] }
  0x67   : > { %3221 = vmatprep.mubr.msk.f32.mxu0 %vm574_vm0, %v1223_v17  ;;  %v1627_v17 = vld [vmem:[%s4127_s1 + $0xc0] sm:$0xff]  ;;  %p3674_p13 = pneg %p3673_p12 }
  0x68   : > { %3155 = vmatmul.mubr.msk.f32.gmra.mrb[28].mxu1 %vm574_vm0, %v570_v27  ;;  %v3498_v27 = vpack.c.bf16 %v2075_v26, %v2074_v25 }
  0x69   : > { %3157 = vmatprep.mubr.msk.f32.mxu1 %vm574_vm0, %v571_v28 }
  0x6a   : > { %3222 = vmatmul.mubr.msk.f32.gmra.mrb[6].mxu0 %vm574_vm0, %v1224_v22  ;;  %v1632_v22 = vld [vmem:[%s4127_s1 + $0xe8] sm:$0xff]  ;;  %3499 = vmatprep.subr.bf16.mxu1 %v3498_v27 }
  0x6b   : > { %3224 = vmatprep.mubr.msk.f32.mxu0 %vm574_vm0, %v1225_v24  ;;  %v1634_v24 = vld [vmem:[%s4127_s1 + $0xf8] sm:$0xff]  ;;  %3501 = vmatpush3.bf16.msra.mxu1 %v3498_v27  ;;  %s3677_s1 = scalar_lea.vmem %s3676_s0, 8192 }
  0x6c   : > { %3158 = vmatmul.mubr.msk.f32.gmra.mrb[30].mxu1 %vm574_vm0, %v572_v34  ;;  %p3679_p1 = scmp.lt.s32.totalorder %s3677_s1, %s3671_s15 }
  0x6e   : > { %3225 = vmatmul.mubr.msk.f32.gmra.mrb[8].mxu0 %vm574_vm0, %v1226_v29  ;;  %p3680_p2 = por %p3679_p1, %p3678_p0 }
  0x6f   : > { %3227 = vmatprep.mubr.msk.f32.mxu0 %vm574_vm0, %v1227_v31 }
  0x70   : > { %p3681_p3 = pnand %p3680_p2, %p3674_p13 }
  0x72   : > { %3228 = vmatmul.mubr.msk.f32.gmra.mrb[10].mxu0 %vm574_vm0, %v1228_v35 }
  0x73   : > { %3230 = vmatprep.mubr.msk.f32.mxu0 %vm574_vm0, %v1229_v37 }
  0x76   : > { %3231 = vmatmul.mubr.msk.f32.gmra.mrb[12].mxu0 %vm574_vm0, %v1230_v38 }
  0x77   : > { %3233 = vmatprep.mubr.msk.f32.mxu0 %vm574_vm0, %v1231_v39 }
  0x7a   : > { %3234 = vmatmul.mubr.msk.f32.gmra.mrb[14].mxu0 %vm574_vm0, %v1232_v40 }
  0x7b   : > { %3236 = vmatprep.mubr.msk.f32.mxu0 %vm574_vm0, %v1233_v41 }
  0x7e   : > { %3237 = vmatmul.mubr.msk.f32.gmra.mrb[16].mxu0 %vm574_vm0, %v1234_v42 }
  0x7f   : > { %3239 = vmatprep.mubr.msk.f32.mxu0 %vm574_vm0, %v1235_v43 }
  0x82   : > { %3240 = vmatmul.mubr.msk.f32.gmra.mrb[18].mxu0 %vm574_vm0, %v1236_v44 }
  0x83   : > { %3242 = vmatprep.mubr.msk.f32.mxu0 %vm574_vm0, %v1237_v45 }
  0x86   : > { %3243 = vmatmul.mubr.msk.f32.gmra.mrb[20].mxu0 %vm574_vm0, %v1238_v46 }
  0x87   : > { %3245 = vmatprep.mubr.msk.f32.mxu0 %vm574_vm0, %v1239_v47 }
  0x8a   : > { %3246 = vmatmul.mubr.msk.f32.gmra.mrb[22].mxu0 %vm574_vm0, %v1240_v48 }
  0x8b   : > { %3248 = vmatprep.mubr.msk.f32.mxu0 %vm574_vm0, %v1241_v49 }
  0x8e   : > { %3249 = vmatmul.mubr.msk.f32.gmra.mrb[24].mxu0 %vm574_vm0, %v1242_v50 }
  0x8f   : > { %3251 = vmatprep.mubr.msk.f32.mxu0 %vm574_vm0, %v1243_v51 }
  0x92   : > { %3252 = vmatmul.mubr.msk.f32.gmra.mrb[26].mxu0 %vm574_vm0, %v1244_v52  ;;  %v2340_v52 = vld [vmem:[%s4540_s11] sm:$0xff] }
  0x93   : > { %3254 = vmatprep.mubr.msk.f32.mxu0 %vm574_vm0, %v1245_v53  ;;  %v2341_v53 = vld [vmem:[%s4540_s11 + $0x8] sm:$0xff] }
  0x96   : > { %3255 = vmatmul.mubr.msk.f32.gmra.mrb[28].mxu0 %vm574_vm0, %v1246_v54 }
  0x97   : > { %3257 = vmatprep.mubr.msk.f32.mxu0 %vm574_vm0, %v1247_v55  ;;  %v3502_v55 = vpack.c.bf16 %v2341_v53, %v2340_v52 }
  0x99   : > { %3503 = vmatprep.subr.bf16.mxu1 %v3502_v55 }
  0x9a   : > { %3258 = vmatmul.mubr.msk.f32.gmra.mrb[30].mxu0 %vm574_vm0, %v1248_v56 }
  0x9b   : > { %3262 = vmatprep.mubr.msk.f32.mxu0 %vm574_vm0, %v1603_v57 }
  0x9e   : > { %3263 = vmatmul.mubr.msk.f32.vlgmr.msra.gmra.mrb[0].mxu0 %vm574_vm0, %v1604_v58 }
  0x9f   : > { %3265 = vmatprep.mubr.msk.f32.mxu0 %vm574_vm0, %v1605_v59 }
  0xa2   : > { %3266 = vmatmul.mubr.msk.f32.gmra.mrb[2].mxu0 %vm574_vm0, %v1606_v60 }
  0xa3   : > { %3268 = vmatprep.mubr.msk.f32.mxu0 %vm574_vm0, %v1607_v61 }
  0xa6   : > { %3269 = vmatmul.mubr.msk.f32.gmra.mrb[4].mxu0 %vm574_vm0, %v1608_v62 }
  0xa7   : > { %3271 = vmatprep.mubr.msk.f32.mxu0 %vm574_vm0, %v1609_v63 }
  0xaa   : > { %3272 = vmatmul.mubr.msk.f32.gmra.mrb[6].mxu0 %vm574_vm0, %v1610_v0  ;;  %v4264_v0 = vld [vmem:[%s4537_s8] ss:$0 sm:$0xff] }
  0xab   : > { %3274 = vmatprep.mubr.msk.f32.mxu0 %vm574_vm0, %v1611_v1 }
  0xae   : > { %3275 = vmatmul.mubr.msk.f32.gmra.mrb[8].mxu0 %vm574_vm0, %v1612_v2 }
  0xaf   : > { %3277 = vmatprep.mubr.msk.f32.mxu0 %vm574_vm0, %v1613_v3 }
  0xb2   : > { %3278 = vmatmul.mubr.msk.f32.gmra.mrb[10].mxu0 %vm574_vm0, %v1614_v4 }
  0xb3   : > { %3280 = vmatprep.mubr.msk.f32.mxu0 %vm574_vm0, %v1615_v5 }
  0xb6   : > { %3281 = vmatmul.mubr.msk.f32.gmra.mrb[12].mxu0 %vm574_vm0, %v1616_v7 }
  0xb7   : > { %3283 = vmatprep.mubr.msk.f32.mxu0 %vm574_vm0, %v1617_v8  ;;  %v2342_v8 = vld [vmem:[%s4540_s11 + $0x10] sm:$0xff] }
  0xba   : > { %3284 = vmatmul.mubr.msk.f32.gmra.mrb[14].mxu0 %vm574_vm0, %v1618_v9  ;;  %v2343_v9 = vld [vmem:[%s4540_s11 + $0x18] sm:$0xff] }
  0xbb   : > { %3286 = vmatprep.mubr.msk.f32.mxu0 %vm574_vm0, %v1619_v10 }
  0xbe   : > { %3287 = vmatmul.mubr.msk.f32.gmra.mrb[16].mxu0 %vm574_vm0, %v1620_v11 }
  0xbf   : > { %3289 = vmatprep.mubr.msk.f32.mxu0 %vm574_vm0, %v1621_v12 }
  0xc2   : > { %3290 = vmatmul.mubr.msk.f32.gmra.mrb[18].mxu0 %vm574_vm0, %v1622_v13 }
  0xc3   : > { %3292 = vmatprep.mubr.msk.f32.mxu0 %vm574_vm0, %v1623_v6 }
  0xc6   : > { %3293 = vmatmul.mubr.msk.f32.gmra.mrb[20].mxu0 %vm574_vm0, %v1624_v14 }
  0xc7   : > { %3295 = vmatprep.mubr.msk.f32.mxu0 %vm574_vm0, %v1625_v15  ;;  %v3506_v15 = vpack.c.bf16 %v2343_v9, %v2342_v8 }
  0xca   : > { %3296 = vmatmul.mubr.msk.f32.gmra.mrb[22].mxu0 %vm574_vm0, %v1626_v16 }
  0xcb   : > { %3298 = vmatprep.mubr.msk.f32.mxu0 %vm574_vm0, %v1627_v17 }
  0xce   : > { %3299 = vmatmul.mubr.msk.f32.gmra.mrb[24].mxu0 %vm574_vm0, %v1628_v18  ;;  %v2344_v18 = vld [vmem:[%s4540_s11 + $0x20] sm:$0xff] }
  0xcf   : > { %3301 = vmatprep.mubr.msk.f32.mxu0 %vm574_vm0, %v1629_v19  ;;  %v2345_v19 = vld [vmem:[%s4540_s11 + $0x28] sm:$0xff] }
  0xd0   : > { %v3510_v26 = vpack.c.bf16 %v2345_v19, %v2344_v18 }
  0xd2   : > { %3302 = vmatmul.mubr.msk.f32.gmra.mrb[26].mxu0 %vm574_vm0, %v1630_v20 }
  0xd3   : > { %3304 = vmatprep.mubr.msk.f32.mxu0 %vm574_vm0, %v1631_v21 }
  0xd6   : > { %3305 = vmatmul.mubr.msk.f32.gmra.mrb[28].mxu0 %vm574_vm0, %v1632_v22 }
  0xd7   : > { %3307 = vmatprep.mubr.msk.f32.mxu0 %vm574_vm0, %v1633_v23 }
  0xda   : > { %3308 = vmatmul.mubr.msk.f32.gmra.mrb[30].mxu0 %vm574_vm0, %v1634_v24 }
  0xf6   : > { %v3114_v28 = vpop.f32.mrb[0].mxu1 }
  0xf7   : > { %v737_v29 = vpop.f32.mrb[1].mxu1 }
  0xfa   : > { %v3117_v30 = vpop.f32.mrb[2].mxu1 }
  0xfb   : > { %v747_v31 = vpop.f32.mrb[3].mxu1 }
  0xfe   : > { %v3120_v32 = vpop.f32.mrb[4].mxu1 }
  0xff   : > { %v757_v33 = vpop.f32.mrb[5].mxu1 }
 0x102   : > { %v4203_v34 = vpop.f32.mrb[6].mxu1 }
 0x103   : > { %v4205_v35 = vpop.f32.mrb[7].mxu1 }
 0x106   : > { %v4207_v36 = vpop.f32.mrb[8].mxu1 }
 0x107   : > { %v4209_v37 = vpop.f32.mrb[9].mxu1 }
 0x10a   : > { %v4211_v38 = vpop.f32.mrb[10].mxu1 }
 0x10b   : > { %v4213_v39 = vpop.f32.mrb[11].mxu1 }
 0x10e   : > { %v4215_v40 = vpop.f32.mrb[12].mxu1 }
 0x10f   : > { %v4217_v41 = vpop.f32.mrb[13].mxu1 }
 0x112   : > { %v4219_v42 = vpop.f32.mrb[14].mxu1 }
 0x113   : > { %v4221_v43 = vpop.f32.mrb[15].mxu1 }
 0x116   : > { %v4223_v44 = vpop.f32.mrb[16].mxu1 }
 0x117   : > { %v4225_v45 = vpop.f32.mrb[17].mxu1 }
 0x11a   : > { %v4227_v46 = vpop.f32.mrb[18].mxu1 }
 0x11b   : > { %v4229_v47 = vpop.f32.mrb[19].mxu1 }
 0x11e   : > { %v4231_v48 = vpop.f32.mrb[20].mxu1 }
 0x11f   : > { %v4233_v49 = vpop.f32.mrb[21].mxu1 }
 0x122   : > { %v4235_v50 = vpop.f32.mrb[22].mxu1 }
 0x123   : > { %v4237_v51 = vpop.f32.mrb[23].mxu1 }
 0x133   : > { %v4245_v54 = vpop.f32.mrb[24].mxu1 }
 0x134   : > { %v4247_v56 = vpop.f32.mrb[25].mxu1 }
 0x137   : > { %v4249_v57 = vpop.f32.mrb[26].mxu1 }
 0x138   : > { %v4251_v58 = vpop.f32.mrb[27].mxu1 }
 0x13b   : > { %v4253_v59 = vpop.f32.mrb[28].mxu1 }
 0x13c   : > { %v4255_v60 = vpop.f32.mrb[29].mxu1 }
 0x13f   : > { %v4257_v61 = vpop.f32.mrb[30].mxu1 }
 0x140   : > { %v4259_v62 = vpop.f32.mrb[31].mxu1 }
 0x171   : > { %v3264_v63 = vpop.f32.mrb[0].mxu0 }
 0x172   : > { %v3534_v1 = vadd.f32 %v3264_v63, %v3114_v28  ;;  %v1798_v2 = vpop.f32.mrb[1].mxu0 }
 0x173   : > { %v3535_v3 = vadd.f32 %v1798_v2, %v737_v29  ;;  %v2346_v29 = vld [vmem:[%s4540_s11 + $0x30] sm:$0xff] }
 0x174   : > { %v1997_v4 = vadd.f32 %v3534_v1, %v4264_v0 }
 0x175   : > { %v1996_v5 = vadd.f32 %v3535_v3, %v4264_v0  ;;  %v3267_v7 = vpop.f32.mrb[2].mxu0  ;;  %v2348_v3 = vld [vmem:[%s4540_s11 + $0x40] sm:$0xff] }
 0x176   : > { %v3536_v10 = vadd.f32 %v3267_v7, %v3117_v30  ;;  %v1808_v11 = vpop.f32.mrb[3].mxu0  ;;  %v2029_v6 = vmax.f32 %v1997_v4, 0.0  ;;  %v2347_v30 = vld [vmem:[%s4540_s11 + $0x38] sm:$0xff] }
 0x177   : > { %v2028_v12 = vmax.f32 %v1996_v5, 0.0  ;;  %v3537_v13 = vadd.f32 %v1808_v11, %v747_v31  ;;  %v3514_v63 = vpack.c.bf16 %v2347_v30, %v2346_v29  ;;  %v2354_v30 = vld [vmem:[%s4540_s11 + $0x70] sm:$0xff] }
 0x178   : > { %v1999_v14 = vadd.f32 %v3536_v10, %v4264_v0 }
 0x179   : > { %v1998_v16 = vadd.f32 %v3537_v13, %v4264_v0  ;;  %v3270_v17 = vpop.f32.mrb[4].mxu0  ;;  %3342 = vmatprep.mubr.f32.mxu1 %v2028_v12  ;;  %v2350_v13 = vld [vmem:[%s4540_s11 + $0x50] sm:$0xff] }
 0x17a   : > { %v3538_v20 = vadd.f32 %v3270_v17, %v3120_v32  ;;  %v1818_v21 = vpop.f32.mrb[5].mxu0  ;;  %3343 = vmatmul.mubr.f32.vlgmr.msra.gmra.mrb[32].mxu1 %v2029_v6  ;;  %v2031_v24 = vmax.f32 %v1999_v14, 0.0 }
 0x17b   : > { %v2030_v22 = vmax.f32 %v1998_v16, 0.0  ;;  %v3539_v23 = vadd.f32 %v1818_v21, %v757_v33  ;;  %3505 = vmatpush3.bf16.msra.mxu1 %v3502_v55  ;;  %v2352_v21 = vld [vmem:[%s4540_s11 + $0x60] sm:$0xff] }
 0x17c   : > { %v2001_v25 = vadd.f32 %v3538_v20, %v4264_v0  ;;  %3507 = vmatprep.subr.bf16.mxu1 %v3506_v15 }
 0x17d   : > { %v2000_v27 = vadd.f32 %v3539_v23, %v4264_v0  ;;  %v3273_v28 = vpop.f32.mrb[6].mxu0  ;;  %3345 = vmatprep.mubr.f32.mxu1 %v2030_v22 }
 0x17e   : > { %v3540_v31 = vadd.f32 %v3273_v28, %v4203_v34  ;;  %v1828_v32 = vpop.f32.mrb[7].mxu0  ;;  %3346 = vmatmul.mubr.f32.gmra.mrb[34].mxu1 %v2031_v24  ;;  %v2033_v53 = vmax.f32 %v2001_v25, 0.0  ;;  %v2349_v34 = vld [vmem:[%s4540_s11 + $0x48] sm:$0xff] }
 0x17f   : > { %v2032_v33 = vmax.f32 %v2000_v27, 0.0  ;;  %v3541_v52 = vadd.f32 %v1828_v32, %v4205_v35  ;;  %3509 = vmatpush3.bf16.msra.mxu1 %v3506_v15  ;;  %v3518_v10 = vpack.c.bf16 %v2349_v34, %v2348_v3 }
 0x180   : > { %v2003_v55 = vadd.f32 %v3540_v31, %v4264_v0  ;;  %3511 = vmatprep.subr.bf16.mxu1 %v3510_v26 }
 0x181   : > { %v2002_v1 = vadd.f32 %v3541_v52, %v4264_v0  ;;  %v3276_v2 = vpop.f32.mrb[8].mxu0  ;;  %3348 = vmatprep.mubr.f32.mxu1 %v2032_v33 }
 0x182   : > { %v3542_v35 = vadd.f32 %v3276_v2, %v4207_v36  ;;  %v1838_v4 = vpop.f32.mrb[9].mxu0  ;;  %3349 = vmatmul.mubr.f32.gmra.mrb[36].mxu1 %v2033_v53  ;;  %v2035_v8 = vmax.f32 %v2003_v55, 0.0  ;;  %v2351_v36 = vld [vmem:[%s4540_s11 + $0x58] sm:$0xff] }
 0x183   : > { %v2034_v5 = vmax.f32 %v2002_v1, 0.0  ;;  %v3543_v7 = vadd.f32 %v1838_v4, %v4209_v37  ;;  %3513 = vmatpush3.bf16.msra.mxu1 %v3510_v26  ;;  %v3522_v18 = vpack.c.bf16 %v2351_v36, %v2350_v13 }
 0x184   : > { %v2005_v9 = vadd.f32 %v3542_v35, %v4264_v0  ;;  %3515 = vmatprep.subr.bf16.mxu1 %v3514_v63 }
 0x185   : > { %v2004_v11 = vadd.f32 %v3543_v7, %v4264_v0  ;;  %v3279_v12 = vpop.f32.mrb[10].mxu0  ;;  %3351 = vmatprep.mubr.f32.mxu1 %v2034_v5 }
 0x186   : > { %v3544_v37 = vadd.f32 %v3279_v12, %v4211_v38  ;;  %v1848_v6 = vpop.f32.mrb[11].mxu0  ;;  %3352 = vmatmul.mubr.f32.gmra.mrb[38].mxu1 %v2035_v8  ;;  %v2037_v16 = vmax.f32 %v2005_v9, 0.0  ;;  %v2353_v38 = vld [vmem:[%s4540_s11 + $0x68] sm:$0xff] }
 0x187   : > { %v2036_v14 = vmax.f32 %v2004_v11, 0.0  ;;  %v3545_v15 = vadd.f32 %v1848_v6, %v4213_v39  ;;  %3517 = vmatpush3.bf16.msra.mxu1 %v3514_v63  ;;  %v3526_v27 = vpack.c.bf16 %v2353_v38, %v2352_v21 }
 0x188   : > { %v2007_v17 = vadd.f32 %v3544_v37, %v4264_v0  ;;  %3519 = vmatprep.subr.bf16.mxu1 %v3518_v10 }
 0x189   : > { %v2006_v19 = vadd.f32 %v3545_v15, %v4264_v0  ;;  %v3282_v20 = vpop.f32.mrb[12].mxu0  ;;  %3354 = vmatprep.mubr.f32.mxu1 %v2036_v14 }
 0x18a   : > { %v3546_v39 = vadd.f32 %v3282_v20, %v4215_v40  ;;  %v1858_v22 = vpop.f32.mrb[13].mxu0  ;;  %3355 = vmatmul.mubr.f32.gmra.mrb[40].mxu1 %v2037_v16  ;;  %v2039_v25 = vmax.f32 %v2007_v17, 0.0  ;;  %v2355_v40 = vld [vmem:[%s4540_s11 + $0x78] sm:$0xff] }
 0x18b   : > { %v2038_v23 = vmax.f32 %v2006_v19, 0.0  ;;  %v3547_v24 = vadd.f32 %v1858_v22, %v4217_v41  ;;  %3521 = vmatpush3.bf16.msra.mxu1 %v3518_v10  ;;  %v3530_v55 = vpack.c.bf16 %v2355_v40, %v2354_v30 }
 0x18c   : > { %v2009_v26 = vadd.f32 %v3546_v39, %v4264_v0  ;;  %3523 = vmatprep.subr.bf16.mxu1 %v3522_v18 }
 0x18d   : > { %v2008_v28 = vadd.f32 %v3547_v24, %v4264_v0  ;;  %v3285_v29 = vpop.f32.mrb[14].mxu0  ;;  %3357 = vmatprep.mubr.f32.mxu1 %v2038_v23 }
 0x18e   : > { %v3548_v41 = vadd.f32 %v3285_v29, %v4219_v42  ;;  %v1868_v31 = vpop.f32.mrb[15].mxu0  ;;  %3358 = vmatmul.mubr.f32.gmra.mrb[42].mxu1 %v2039_v25  ;;  %v2041_v52 = vmax.f32 %v2009_v26, 0.0 }
 0x18f   : > { %v2040_v32 = vmax.f32 %v2008_v28, 0.0  ;;  %v3549_v33 = vadd.f32 %v1868_v31, %v4221_v43  ;;  %3525 = vmatpush3.bf16.msra.mxu1 %v3522_v18 }
 0x190   : > { %v2011_v53 = vadd.f32 %v3548_v41, %v4264_v0  ;;  %3527 = vmatprep.subr.bf16.mxu1 %v3526_v27 }
 0x191   : > { %v2010_v63 = vadd.f32 %v3549_v33, %v4264_v0  ;;  %v3288_v1 = vpop.f32.mrb[16].mxu0  ;;  %3360 = vmatprep.mubr.f32.mxu1 %v2040_v32 }
 0x192   : > { %v3550_v2 = vadd.f32 %v3288_v1, %v4223_v44  ;;  %v1878_v3 = vpop.f32.mrb[17].mxu0  ;;  %3361 = vmatmul.mubr.f32.gmra.mrb[44].mxu1 %v2041_v52  ;;  %v2043_v35 = vmax.f32 %v2011_v53, 0.0 }
 0x193   : > { %v2042_v42 = vmax.f32 %v2010_v63, 0.0  ;;  %v3551_v34 = vadd.f32 %v1878_v3, %v4225_v45  ;;  %3529 = vmatpush3.bf16.msra.mxu1 %v3526_v27 }
 0x194   : > { %v2013_v43 = vadd.f32 %v3550_v2, %v4264_v0  ;;  %3531 = vmatprep.subr.bf16.mxu1 %v3530_v55 }
 0x195   : > { %v2012_v4 = vadd.f32 %v3551_v34, %v4264_v0  ;;  %v3291_v5 = vpop.f32.mrb[18].mxu0  ;;  %3363 = vmatprep.mubr.f32.mxu1 %v2042_v42 }
 0x196   : > { %v3552_v7 = vadd.f32 %v3291_v5, %v4227_v46  ;;  %v1888_v8 = vpop.f32.mrb[19].mxu0  ;;  %3364 = vmatmul.mubr.f32.gmra.mrb[46].mxu1 %v2043_v35  ;;  %v2045_v10 = vmax.f32 %v2013_v43, 0.0 }
 0x197   : > { %v2044_v9 = vmax.f32 %v2012_v4, 0.0  ;;  %v3553_v44 = vadd.f32 %v1888_v8, %v4229_v47  ;;  %3533 = vmatpush3.bf16.msra.mxu1 %v3530_v55 }
 0x198   : > { %v2015_v45 = vadd.f32 %v3552_v7, %v4264_v0 }
 0x199   : > { %v2014_v11 = vadd.f32 %v3553_v44, %v4264_v0  ;;  %v3294_v12 = vpop.f32.mrb[20].mxu0  ;;  %3366 = vmatprep.mubr.f32.mxu1 %v2044_v9 }
 0x19a   : > { %v3554_v13 = vadd.f32 %v3294_v12, %v4231_v48  ;;  %v1898_v36 = vpop.f32.mrb[21].mxu0  ;;  %3367 = vmatmul.mubr.f32.gmra.mrb[48].mxu1 %v2045_v10  ;;  %v2047_v6 = vmax.f32 %v2015_v45, 0.0 }
 0x19b   : > { %v2046_v37 = vmax.f32 %v2014_v11, 0.0  ;;  %v3555_v46 = vadd.f32 %v1898_v36, %v4233_v49 }
 0x19c   : > { %v2017_v14 = vadd.f32 %v3554_v13, %v4264_v0 }
 0x19d   : > { %v2016_v47 = vadd.f32 %v3555_v46, %v4264_v0  ;;  %v3297_v15 = vpop.f32.mrb[22].mxu0  ;;  %3369 = vmatprep.mubr.f32.mxu1 %v2046_v37 }
 0x19e   : > { %v3556_v16 = vadd.f32 %v3297_v15, %v4235_v50  ;;  %v1908_v17 = vpop.f32.mrb[23].mxu0  ;;  %3370 = vmatmul.mubr.f32.gmra.mrb[50].mxu1 %v2047_v6  ;;  %v2049_v48 = vmax.f32 %v2017_v14, 0.0 }
 0x19f   : > { %v2048_v18 = vmax.f32 %v2016_v47, 0.0  ;;  %v3557_v19 = vadd.f32 %v1908_v17, %v4237_v51 }
 0x1a0   : > { %v2019_v20 = vadd.f32 %v3556_v16, %v4264_v0 }
 0x1a1   : > { %v2018_v21 = vadd.f32 %v3557_v19, %v4264_v0  ;;  %v3300_v49 = vpop.f32.mrb[24].mxu0  ;;  %3372 = vmatprep.mubr.f32.mxu1 %v2048_v18 }
 0x1a2   : > { %v3558_v38 = vadd.f32 %v3300_v49, %v4245_v54  ;;  %v1918_v39 = vpop.f32.mrb[25].mxu0  ;;  %3373 = vmatmul.mubr.f32.gmra.mrb[52].mxu1 %v2049_v48  ;;  %v2051_v50 = vmax.f32 %v2019_v20, 0.0 }
 0x1a3   : > { %v2050_v22 = vmax.f32 %v2018_v21, 0.0  ;;  %v3559_v23 = vadd.f32 %v1918_v39, %v4247_v56 }
 0x1a4   : > { %v2021_v24 = vadd.f32 %v3558_v38, %v4264_v0 }
 0x1a5   : > { %v2020_v25 = vadd.f32 %v3559_v23, %v4264_v0  ;;  %v3303_v51 = vpop.f32.mrb[26].mxu0  ;;  %3375 = vmatprep.mubr.f32.mxu1 %v2050_v22 }
 0x1a6   : > { %v3560_v26 = vadd.f32 %v3303_v51, %v4249_v57  ;;  %v1928_v27 = vpop.f32.mrb[27].mxu0  ;;  %3376 = vmatmul.mubr.f32.gmra.mrb[54].mxu1 %v2051_v50  ;;  %v2053_v54 = vmax.f32 %v2021_v24, 0.0 }
 0x1a7   : > { %v2052_v28 = vmax.f32 %v2020_v25, 0.0  ;;  %v3561_v29 = vadd.f32 %v1928_v27, %v4251_v58 }
 0x1a8   : > { %v2023_v30 = vadd.f32 %v3560_v26, %v4264_v0 }
 0x1a9   : > { %v2022_v40 = vadd.f32 %v3561_v29, %v4264_v0  ;;  %v3306_v56 = vpop.f32.mrb[28].mxu0  ;;  %3378 = vmatprep.mubr.f32.mxu1 %v2052_v28 }
 0x1aa   : > { %v3562_v41 = vadd.f32 %v3306_v56, %v4253_v59  ;;  %v1938_v31 = vpop.f32.mrb[29].mxu0  ;;  %3379 = vmatmul.mubr.f32.gmra.mrb[56].mxu1 %v2053_v54  ;;  %v2055_v57 = vmax.f32 %v2023_v30, 0.0 }
 0x1ab   : > { %v2054_v32 = vmax.f32 %v2022_v40, 0.0  ;;  %v3563_v33 = vadd.f32 %v1938_v31, %v4255_v60 }
 0x1ac   : > { %v2025_v52 = vadd.f32 %v3562_v41, %v4264_v0 }
 0x1ad   : > { %v2024_v53 = vadd.f32 %v3563_v33, %v4264_v0  ;;  %v3309_v58 = vpop.f32.mrb[30].mxu0  ;;  %3381 = vmatprep.mubr.f32.mxu1 %v2054_v32 }
 0x1ae   : > { %v3564_v55 = vadd.f32 %v3309_v58, %v4257_v61  ;;  %v1948_v63 = vpop.f32.mrb[31].mxu0  ;;  %3382 = vmatmul.mubr.f32.gmra.mrb[58].mxu1 %v2055_v57  ;;  %v2057_v59 = vmax.f32 %v2025_v52, 0.0  ;;  %v4369_v61 = vld [vmem:[%s4539_s10] ss:$0 sm:$0xff] }
 0x1af   : > { %v2056_v1 = vmax.f32 %v2024_v53, 0.0  ;;  %v3565_v2 = vadd.f32 %v1948_v63, %v4259_v62 }
 0x1b0   : > { %v2027_v3 = vadd.f32 %v3564_v55, %v4264_v0 }
 0x1b1   : > { %v2026_v42 = vadd.f32 %v3565_v2, %v4264_v0  ;;  %3384 = vmatprep.mubr.f32.mxu1 %v2056_v1 }
 0x1b2   : > { %3385 = vmatmul.mubr.f32.gmra.mrb[60].mxu1 %v2057_v59  ;;  %v2059_v34 = vmax.f32 %v2027_v3, 0.0 }
 0x1b3   : > { %v2058_v60 = vmax.f32 %v2026_v42, 0.0 }
 0x1b5   : > { %3387 = vmatprep.mubr.f32.mxu1 %v2058_v60 }
 0x1b6   : > { %3388 = vmatmul.mubr.f32.gmra.mrb[62].mxu1 %v2059_v34 }
 0x24d   : > { %v3344_v35 = vpop.f32.mrb[32].mxu1 }
 0x24e   : > { %v2155_v43 = vadd.f32 %v3344_v35, %v4369_v61  ;;  %v2149_v62 = vpop.f32.mrb[33].mxu1 }
 0x24f   : > { %v2150_v4 = vadd.f32 %v4369_v61, %v2149_v62 }
 0x250   : > { %v2309_v0 = vmax.f32 %v2155_v43, 0.0 }
 0x251   : > { %v2308_v5 = vmax.f32 %v2150_v4, 0.0  ;;  %v3347_v7 = vpop.f32.mrb[34].mxu1 }
 0x252   : > { %v2165_v8 = vadd.f32 %v3347_v7, %v4369_v61  ;;  %v2159_v9 = vpop.f32.mrb[35].mxu1 }
 0x253   : > { %v2160_v44 = vadd.f32 %v4369_v61, %v2159_v9  ;;  %3422 = vmatprep.mubr.f32.mxu1 %v2308_v5 }
 0x254   : > { %3423 = vmatmul.mubr.f32.vlgmr.msra.gmra.mrb[64].mxu1 %v2309_v0  ;;  %v2311_v11 = vmax.f32 %v2165_v8, 0.0 }
 0x255   : > { %v2310_v10 = vmax.f32 %v2160_v44, 0.0  ;;  %v3350_v45 = vpop.f32.mrb[36].mxu1 }
 0x256   : > { %v2175_v12 = vadd.f32 %v3350_v45, %v4369_v61  ;;  %v2169_v13 = vpop.f32.mrb[37].mxu1 }
 0x257   : > { %v2170_v36 = vadd.f32 %v4369_v61, %v2169_v13  ;;  %3425 = vmatprep.mubr.f32.mxu1 %v2310_v10 }
 0x258   : > { %3426 = vmatmul.mubr.f32.gmra.mrb[66].mxu1 %v2311_v11  ;;  %v2313_v6 = vmax.f32 %v2175_v12, 0.0 }
 0x259   : > { %v2312_v37 = vmax.f32 %v2170_v36, 0.0  ;;  %v3353_v46 = vpop.f32.mrb[38].mxu1 }
 0x25a   : > { %v2185_v14 = vadd.f32 %v3353_v46, %v4369_v61  ;;  %v2179_v47 = vpop.f32.mrb[39].mxu1 }
 0x25b   : > { %v2180_v15 = vadd.f32 %v4369_v61, %v2179_v47  ;;  %3428 = vmatprep.mubr.f32.mxu1 %v2312_v37 }
 0x25c   : > { %3429 = vmatmul.mubr.f32.gmra.mrb[68].mxu1 %v2313_v6  ;;  %v2315_v18 = vmax.f32 %v2185_v14, 0.0 }
 0x25d   : > { %v2314_v16 = vmax.f32 %v2180_v15, 0.0  ;;  %v3356_v17 = vpop.f32.mrb[40].mxu1 }
 0x25e   : > { %v2195_v19 = vadd.f32 %v3356_v17, %v4369_v61  ;;  %v2189_v48 = vpop.f32.mrb[41].mxu1 }
 0x25f   : > { %v2190_v20 = vadd.f32 %v4369_v61, %v2189_v48  ;;  %3431 = vmatprep.mubr.f32.mxu1 %v2314_v16 }
 0x260   : > { %3432 = vmatmul.mubr.f32.gmra.mrb[70].mxu1 %v2315_v18  ;;  %v2317_v38 = vmax.f32 %v2195_v19, 0.0 }
 0x261   : > { %v2316_v21 = vmax.f32 %v2190_v20, 0.0  ;;  %v3359_v49 = vpop.f32.mrb[42].mxu1 }
 0x262   : > { %v2205_v39 = vadd.f32 %v3359_v49, %v4369_v61  ;;  %v2199_v22 = vpop.f32.mrb[43].mxu1 }
 0x263   : > { %v2200_v23 = vadd.f32 %v4369_v61, %v2199_v22  ;;  %3434 = vmatprep.mubr.f32.mxu1 %v2316_v21 }
 0x264   : > { %3435 = vmatmul.mubr.f32.gmra.mrb[72].mxu1 %v2317_v38  ;;  %v2319_v25 = vmax.f32 %v2205_v39, 0.0 }
 0x265   : > { %v2318_v50 = vmax.f32 %v2200_v23, 0.0  ;;  %v3362_v24 = vpop.f32.mrb[44].mxu1  ;;  %v4409_v23 = vld [vmem:[%s4541_s12] ss:$0 sm:$0xff] }
 0x266   : > { %v2215_v51 = vadd.f32 %v3362_v24, %v4369_v61  ;;  %v2209_v26 = vpop.f32.mrb[45].mxu1 }
 0x267   : > { %v2210_v27 = vadd.f32 %v4369_v61, %v2209_v26  ;;  %3437 = vmatprep.mubr.f32.mxu1 %v2318_v50 }
 0x268   : > { %3438 = vmatmul.mubr.f32.gmra.mrb[74].mxu1 %v2319_v25  ;;  %v2321_v54 = vmax.f32 %v2215_v51, 0.0 }
 0x269   : > { %v2320_v28 = vmax.f32 %v2210_v27, 0.0  ;;  %v3365_v29 = vpop.f32.mrb[46].mxu1 }
 0x26a   : > { %v2225_v30 = vadd.f32 %v3365_v29, %v4369_v61  ;;  %v2219_v40 = vpop.f32.mrb[47].mxu1 }
 0x26b   : > { %v2220_v56 = vadd.f32 %v4369_v61, %v2219_v40  ;;  %3440 = vmatprep.mubr.f32.mxu1 %v2320_v28 }
 0x26c   : > { %3441 = vmatmul.mubr.f32.gmra.mrb[76].mxu1 %v2321_v54  ;;  %v2323_v32 = vmax.f32 %v2225_v30, 0.0 }
 0x26d   : > { %v2322_v41 = vmax.f32 %v2220_v56, 0.0  ;;  %v3368_v31 = vpop.f32.mrb[48].mxu1 }
 0x26e   : > { %v2235_v33 = vadd.f32 %v3368_v31, %v4369_v61  ;;  %v2229_v57 = vpop.f32.mrb[49].mxu1 }
 0x26f   : > { %v2230_v52 = vadd.f32 %v4369_v61, %v2229_v57  ;;  %3443 = vmatprep.mubr.f32.mxu1 %v2322_v41 }
 0x270   : > { %3444 = vmatmul.mubr.f32.gmra.mrb[78].mxu1 %v2323_v32  ;;  %v2325_v55 = vmax.f32 %v2235_v33, 0.0 }
 0x271   : > { %v2324_v53 = vmax.f32 %v2230_v52, 0.0  ;;  %v3371_v58 = vpop.f32.mrb[50].mxu1 }
 0x272   : > { %v2245_v63 = vadd.f32 %v3371_v58, %v4369_v61  ;;  %v2239_v1 = vpop.f32.mrb[51].mxu1 }
 0x273   : > { %v2240_v2 = vadd.f32 %v4369_v61, %v2239_v1  ;;  %3446 = vmatprep.mubr.f32.mxu1 %v2324_v53 }
 0x274   : > { %3447 = vmatmul.mubr.f32.gmra.mrb[80].mxu1 %v2325_v55  ;;  %v2327_v42 = vmax.f32 %v2245_v63, 0.0 }
 0x275   : > { %v2326_v59 = vmax.f32 %v2240_v2, 0.0  ;;  %v3374_v3 = vpop.f32.mrb[52].mxu1 }
 0x276   : > { %v2255_v60 = vadd.f32 %v3374_v3, %v4369_v61  ;;  %v2249_v34 = vpop.f32.mrb[53].mxu1 }
 0x277   : > { %v2250_v35 = vadd.f32 %v4369_v61, %v2249_v34  ;;  %3449 = vmatprep.mubr.f32.mxu1 %v2326_v59 }
 0x278   : > { %3450 = vmatmul.mubr.f32.gmra.mrb[82].mxu1 %v2327_v42  ;;  %v2329_v4 = vmax.f32 %v2255_v60, 0.0 }
 0x279   : > { %v2328_v43 = vmax.f32 %v2250_v35, 0.0  ;;  %v3377_v62 = vpop.f32.mrb[54].mxu1 }
 0x27a   : > { %v2265_v5 = vadd.f32 %v3377_v62, %v4369_v61  ;;  %v2259_v7 = vpop.f32.mrb[55].mxu1 }
 0x27b   : > { %v2260_v0 = vadd.f32 %v4369_v61, %v2259_v7  ;;  %3452 = vmatprep.mubr.f32.mxu1 %v2328_v43 }
 0x27c   : > { %3453 = vmatmul.mubr.f32.gmra.mrb[84].mxu1 %v2329_v4  ;;  %v2331_v44 = vmax.f32 %v2265_v5, 0.0 }
 0x27d   : > { %v2330_v8 = vmax.f32 %v2260_v0, 0.0  ;;  %v3380_v9 = vpop.f32.mrb[56].mxu1 }
 0x27e   : > { %v2275_v10 = vadd.f32 %v3380_v9, %v4369_v61  ;;  %v2269_v45 = vpop.f32.mrb[57].mxu1 }
 0x27f   : > { %v2270_v11 = vadd.f32 %v4369_v61, %v2269_v45  ;;  %3455 = vmatprep.mubr.f32.mxu1 %v2330_v8 }
 0x280   : > { %3456 = vmatmul.mubr.f32.gmra.mrb[86].mxu1 %v2331_v44  ;;  %v2333_v36 = vmax.f32 %v2275_v10, 0.0 }
 0x281   : > { %v2332_v12 = vmax.f32 %v2270_v11, 0.0  ;;  %v3383_v13 = vpop.f32.mrb[58].mxu1 }
 0x282   : > { %v2285_v37 = vadd.f32 %v3383_v13, %v4369_v61  ;;  %v2279_v46 = vpop.f32.mrb[59].mxu1 }
 0x283   : > { %v2280_v6 = vadd.f32 %v4369_v61, %v2279_v46  ;;  %3458 = vmatprep.mubr.f32.mxu1 %v2332_v12 }
 0x284   : > { %3459 = vmatmul.mubr.f32.gmra.mrb[88].mxu1 %v2333_v36  ;;  %v2335_v15 = vmax.f32 %v2285_v37, 0.0 }
 0x285   : > { %v2334_v14 = vmax.f32 %v2280_v6, 0.0  ;;  %v3386_v47 = vpop.f32.mrb[60].mxu1 }
 0x286   : > { %v2295_v16 = vadd.f32 %v3386_v47, %v4369_v61  ;;  %v2289_v17 = vpop.f32.mrb[61].mxu1 }
 0x287   : > { %v2290_v18 = vadd.f32 %v4369_v61, %v2289_v17  ;;  %3461 = vmatprep.mubr.f32.mxu1 %v2334_v14 }
 0x288   : > { %3462 = vmatmul.mubr.f32.gmra.mrb[90].mxu1 %v2335_v15  ;;  %v2337_v20 = vmax.f32 %v2295_v16, 0.0 }
 0x289   : > { %v2336_v19 = vmax.f32 %v2290_v18, 0.0  ;;  %v3389_v48 = vpop.f32.mrb[62].mxu1 }
 0x28a   : > { %v2305_v21 = vadd.f32 %v3389_v48, %v4369_v61  ;;  %v2299_v49 = vpop.f32.mrb[63].mxu1 }
 0x28b   : > { %v2300_v38 = vadd.f32 %v4369_v61, %v2299_v49  ;;  %3464 = vmatprep.mubr.f32.mxu1 %v2336_v19 }
 0x28c   : > { %3465 = vmatmul.mubr.f32.gmra.mrb[92].mxu1 %v2337_v20  ;;  %v2339_v22 = vmax.f32 %v2305_v21, 0.0 }
 0x28d   : > { %v2338_v39 = vmax.f32 %v2300_v38, 0.0 }
 0x28f   : > { %3467 = vmatprep.mubr.f32.mxu1 %v2338_v39 }
 0x290   : > { %3468 = vmatmul.mubr.f32.gmra.mrb[94].mxu1 %v2339_v22 }
 0x327   : > { %v3424_v50 = vpop.f32.mrb[64].mxu1 }
 0x328   : > { %v2435_v24 = vadd.f32 %v3424_v50, %v4409_v23  ;;  %v2429_v25 = vpop.f32.mrb[65].mxu1 }
 0x329   : > { %v2430_v61 = vadd.f32 %v4409_v23, %v2429_v25 }
 0x32a   : > { %2589 = vst [vmem:[%s4413_s30 + $0x8] sm:$0xff] %v2435_v24 }
 0x32b   : > { %2588 = vst [vmem:[%s4413_s30] sm:$0xff] %v2430_v61  ;;  %v3427_v51 = vpop.f32.mrb[66].mxu1 }
 0x32c   : > { %v2445_v26 = vadd.f32 %v3427_v51, %v4409_v23  ;;  %v2439_v27 = vpop.f32.mrb[67].mxu1 }
 0x32d   : > { %v2440_v28 = vadd.f32 %v4409_v23, %v2439_v27 }
 0x32e   : > { %2591 = vst [vmem:[%s4413_s30 + $0x18] sm:$0xff] %v2445_v26 }
 0x32f   : > { %2590 = vst [vmem:[%s4413_s30 + $0x10] sm:$0xff] %v2440_v28  ;;  %v3430_v29 = vpop.f32.mrb[68].mxu1 }
 0x330   : > { %v2455_v54 = vadd.f32 %v3430_v29, %v4409_v23  ;;  %v2449_v30 = vpop.f32.mrb[69].mxu1 }
 0x331   : > { %v2450_v40 = vadd.f32 %v4409_v23, %v2449_v30 }
 0x332   : > { %2593 = vst [vmem:[%s4413_s30 + $0x28] sm:$0xff] %v2455_v54 }
 0x333   : > { %2592 = vst [vmem:[%s4413_s30 + $0x20] sm:$0xff] %v2450_v40  ;;  %v3433_v56 = vpop.f32.mrb[70].mxu1 }
 0x334   : > { %v2465_v41 = vadd.f32 %v3433_v56, %v4409_v23  ;;  %v2459_v31 = vpop.f32.mrb[71].mxu1 }
 0x335   : > { %v2460_v32 = vadd.f32 %v4409_v23, %v2459_v31 }
 0x336   : > { %2595 = vst [vmem:[%s4413_s30 + $0x38] sm:$0xff] %v2465_v41 }
 0x337   : > { %2594 = vst [vmem:[%s4413_s30 + $0x30] sm:$0xff] %v2460_v32  ;;  %v3436_v33 = vpop.f32.mrb[72].mxu1 }
 0x338   : > { %v2475_v57 = vadd.f32 %v3436_v33, %v4409_v23  ;;  %v2469_v52 = vpop.f32.mrb[73].mxu1 }
 0x339   : > { %v2470_v53 = vadd.f32 %v4409_v23, %v2469_v52 }
 0x33a   : > { %2597 = vst [vmem:[%s4413_s30 + $0x48] sm:$0xff] %v2475_v57 }
 0x33b   : > { %2596 = vst [vmem:[%s4413_s30 + $0x40] sm:$0xff] %v2470_v53  ;;  %v3439_v58 = vpop.f32.mrb[74].mxu1 }
 0x33c   : > { %v2485_v55 = vadd.f32 %v3439_v58, %v4409_v23  ;;  %v2479_v63 = vpop.f32.mrb[75].mxu1 }
 0x33d   : > { %v2480_v1 = vadd.f32 %v4409_v23, %v2479_v63 }
 0x33e   : > { %2599 = vst [vmem:[%s4413_s30 + $0x58] sm:$0xff] %v2485_v55 }
 0x33f   : > { %2598 = vst [vmem:[%s4413_s30 + $0x50] sm:$0xff] %v2480_v1  ;;  %v3442_v2 = vpop.f32.mrb[76].mxu1 }
 0x340   : > { %v2495_v59 = vadd.f32 %v3442_v2, %v4409_v23  ;;  %v2489_v3 = vpop.f32.mrb[77].mxu1 }
 0x341   : > { %v2490_v42 = vadd.f32 %v4409_v23, %v2489_v3 }
 0x342   : > { %2601 = vst [vmem:[%s4413_s30 + $0x68] sm:$0xff] %v2495_v59 }
 0x343   : > { %2600 = vst [vmem:[%s4413_s30 + $0x60] sm:$0xff] %v2490_v42  ;;  %v3445_v60 = vpop.f32.mrb[78].mxu1 }
 0x344   : > { %v2505_v34 = vadd.f32 %v3445_v60, %v4409_v23  ;;  %v2499_v35 = vpop.f32.mrb[79].mxu1 }
 0x345   : > { %v2500_v43 = vadd.f32 %v4409_v23, %v2499_v35 }
 0x346   : > { %2603 = vst [vmem:[%s4413_s30 + $0x78] sm:$0xff] %v2505_v34 }
 0x347   : > { %2602 = vst [vmem:[%s4413_s30 + $0x70] sm:$0xff] %v2500_v43  ;;  %v3448_v62 = vpop.f32.mrb[80].mxu1 }
 0x348   : > { %v2515_v4 = vadd.f32 %v3448_v62, %v4409_v23  ;;  %v2509_v5 = vpop.f32.mrb[81].mxu1 }
 0x349   : > { %v2510_v7 = vadd.f32 %v4409_v23, %v2509_v5 }
 0x34a   : > { %2605 = vst [vmem:[%s4413_s30 + $0x88] sm:$0xff] %v2515_v4 }
 0x34b   : > { %2604 = vst [vmem:[%s4413_s30 + $0x80] sm:$0xff] %v2510_v7  ;;  %v3451_v0 = vpop.f32.mrb[82].mxu1 }
 0x34c   : > { %v2525_v8 = vadd.f32 %v3451_v0, %v4409_v23  ;;  %v2519_v9 = vpop.f32.mrb[83].mxu1 }
 0x34d   : > { %v2520_v44 = vadd.f32 %v4409_v23, %v2519_v9 }
 0x34e   : > { %2607 = vst [vmem:[%s4413_s30 + $0x98] sm:$0xff] %v2525_v8 }
 0x34f   : > { %2606 = vst [vmem:[%s4413_s30 + $0x90] sm:$0xff] %v2520_v44  ;;  %v3454_v10 = vpop.f32.mrb[84].mxu1 }
 0x350   : > { %v2535_v45 = vadd.f32 %v3454_v10, %v4409_v23  ;;  %v2529_v11 = vpop.f32.mrb[85].mxu1 }
 0x351   : > { %v2530_v12 = vadd.f32 %v4409_v23, %v2529_v11 }
 0x352   : > { %2609 = vst [vmem:[%s4413_s30 + $0xa8] sm:$0xff] %v2535_v45 }
 0x353   : > { %2608 = vst [vmem:[%s4413_s30 + $0xa0] sm:$0xff] %v2530_v12  ;;  %v3457_v13 = vpop.f32.mrb[86].mxu1 }
 0x354   : > { %v2545_v36 = vadd.f32 %v3457_v13, %v4409_v23  ;;  %v2539_v37 = vpop.f32.mrb[87].mxu1 }
 0x355   : > { %v2540_v46 = vadd.f32 %v4409_v23, %v2539_v37 }
 0x356   : > { %2611 = vst [vmem:[%s4413_s30 + $0xb8] sm:$0xff] %v2545_v36 }
 0x357   : > { %2610 = vst [vmem:[%s4413_s30 + $0xb0] sm:$0xff] %v2540_v46  ;;  %v3460_v6 = vpop.f32.mrb[88].mxu1 }
 0x358   : > { %v2555_v14 = vadd.f32 %v3460_v6, %v4409_v23  ;;  %v2549_v47 = vpop.f32.mrb[89].mxu1 }
 0x359   : > { %v2550_v15 = vadd.f32 %v4409_v23, %v2549_v47 }
 0x35a   : > { %2613 = vst [vmem:[%s4413_s30 + $0xc8] sm:$0xff] %v2555_v14 }
 0x35b   : > { %2612 = vst [vmem:[%s4413_s30 + $0xc0] sm:$0xff] %v2550_v15  ;;  %v3463_v16 = vpop.f32.mrb[90].mxu1 }
 0x35c   : > { %v2565_v17 = vadd.f32 %v3463_v16, %v4409_v23  ;;  %v2559_v18 = vpop.f32.mrb[91].mxu1 }
 0x35d   : > { %v2560_v19 = vadd.f32 %v4409_v23, %v2559_v18 }
 0x35e   : > { %2615 = vst [vmem:[%s4413_s30 + $0xd8] sm:$0xff] %v2565_v17 }
 0x35f   : > { %2614 = vst [vmem:[%s4413_s30 + $0xd0] sm:$0xff] %v2560_v19  ;;  %v3466_v48 = vpop.f32.mrb[92].mxu1 }
 0x360   : > { %v2575_v20 = vadd.f32 %v3466_v48, %v4409_v23  ;;  %v2569_v21 = vpop.f32.mrb[93].mxu1 }
 0x361   : > { %v2570_v49 = vadd.f32 %v4409_v23, %v2569_v21 }
 0x362   : > { %2617 = vst [vmem:[%s4413_s30 + $0xe8] sm:$0xff] %v2575_v20 }
 0x363   : > { %2616 = vst [vmem:[%s4413_s30 + $0xe0] sm:$0xff] %v2570_v49  ;;  %v3469_v38 = vpop.f32.mrb[94].mxu1 }
 0x364   : > { %v2585_v39 = vadd.f32 %v3469_v38, %v4409_v23  ;;  %v2579_v22 = vpop.f32.mrb[95].mxu1 }
 0x365   : > { %v2580_v50 = vadd.f32 %v4409_v23, %v2579_v22 }
 0x366   : > { %2619 = vst [vmem:[%s4413_s30 + $0xf8] sm:$0xff] %v2585_v39 }
 0x367   : > { %2618 = vst [vmem:[%s4413_s30 + $0xf0] sm:$0xff] %v2580_v50 }
 0x368   : > { %3684 = shalt.err (!%p3681_p3)
}
 0x369   : > { %s3685_s20 = scalar_lea.hbm %s4479_s24, 4096  ;;  %s3689_s21 = scalar_lea.hbm %s4542_s13, 8192 }
 0x36a   : > { %p3686_p4 = scmp.ne.s32.totalorder %s4479_s24, %s3685_s20  ;;  %p3690_p9 = scmp.lt.u32.totalorder %s4479_s24, %s4542_s13 }
 0x36b   : > { %p3691_p10 = scmp.lt.u32.totalorder %s3689_s21, %s3685_s20  ;;  %p3693_p12 = scmp.lt.u32.totalorder %s3685_s20, %s4479_s24 }
 0x36c   : > { %p3687_p7 = pnand %p3686_p4, %p3846_p5 }
 0x36d   : > { %p3692_p11 = por %p3691_p10, %p3690_p9 }
 0x36e   : > { %p3688_p8 = pneg %p3687_p7 }
 0x36f   : > { %p3694_p13 = por %p3693_p12, %p3692_p11 }
 0x371   : > { %p3695_p0 = pnand %p3694_p13, %p3688_p8 }
 0x373   : > { %3698 = shalt.err (!%p3695_p0)
}
 0x374   : > { %s3736_s15 = smov 128   ;;  %s3737_s0 = smov 8  }
 0x375   : > { %3630 = dma.vmem_to_hbm [thread:$0]  (%p3846_p5), %s4481_s4, 4096, %s4479_s24, %s4488_s29, %s3736_s15, %s3736_s15, %s3737_s0  }
 0x376 PF: > { %p3636_p1 = scmp.ge.s32.totalorder %s3733_s28, 2  ;;  %s2649_s1 = sand.u32 1, %s3721_s25  }
 0x377   : > { %s2650_s20 = scalar_lea.sflag [#allocation3], %s2649_s1 }
 0x378   : > { %p3633_p2 = pnand %p3636_p1, %p3850_p6 }
 0x37a   : > { %3716 = dma.done.wait (!%p3633_p2), %s2650_s20, 4096  }
 0x37b   : > { %3718 = vsyncadd (!%p3633_p2), %s2650_s20, 4294963200  ;;  %p23_p3 = scmp.ge.s32.totalorder %s3833_s14, 4   ;;  %s4551_s25 = smov %s3725_s26 }
 0x37c   : > { %s4552_s26 = smov %s3729_s27  ;;  %s4553_s27 = smov %s3844_s17 }
 0x37d   : > { %s4554_s28 = smov %s3833_s14  ;;  %25 = sbr.rel (!%p23_p3) target bundleno = 7 (0x7), region = 116 }
 0x384   :  { %2655 = vsyncpa [#allocation3], 1 }
 0x385   :  { %2657 = vsyncpa [#allocation3 + $0x1], 1 }

</bundles_post_ra>
